<compile_context>
chip_gen: v6e
topology: v6e:2x2x1
jax: 0.10.0
libtpu: 0.0.40
codegen_flags: <defaults>
</compile_context>

<pallas_src>
import functools
import math

import jax
import jax.numpy as jnp
from jax import lax
from jax.experimental import pallas as pl
from jax.experimental.pallas import tpu as pltpu

LANE = 128


def _round_up(v, m):
    return (v + m - 1) // m * m


# ----------------------------------------------------------------------------
# Fused kernel: entire 10-layer GCN in one invocation (no grid).
# ----------------------------------------------------------------------------
def _gcn10_kernel(x_ref, adj_ref, w_ref, b_ref, o_ref, *, n_layers, nclass):
    """
    x_ref  : (Np, Fp)        f32   padded node features (read once)
    adj_ref: (Np, Np)        bf16  padded adjacency (resident)
    w_ref  : (L, Fp, Fp)     bf16  stacked padded weights (resident)
    b_ref  : (L, 1, Fp)      f32   stacked padded biases
    o_ref  : (Np, Fp)        f32   padded log-softmax output
    """
    adj = adj_ref[...]  # bf16, kept live for both matmuls of every layer

    def layer(h_f32, l, apply_relu):
        w = w_ref[l]                      # (Fp, Fp) bf16
        b = b_ref[l]                      # (1, Fp)  f32
        # GraphConvolution: adj @ (h @ W) + b  — two MXU matmuls, f32 accum.
        support = jnp.dot(h_f32.astype(jnp.bfloat16), w,
                          preferred_element_type=jnp.float32)
        out = jnp.dot(adj, support.astype(jnp.bfloat16),
                      preferred_element_type=jnp.float32) + b
        if apply_relu:
            out = jnp.maximum(out, 0.0)
        return out

    # Hidden layers gc1..gc9 (ReLU). Fully unrolled in-kernel loop; the
    # activation is a loop-carried value (no HBM round trip, no scratch).
    h = lax.fori_loop(
        0, n_layers - 1,
        lambda l, h: layer(h, l, True),
        x_ref[...].astype(jnp.float32),
        unroll=True,
    )

    # F.dropout(training=False) == identity.

    # Final layer gc10 (no ReLU), then fused log_softmax over the real classes
    # (padded class columns masked so they don't affect the normalizer).
    logits = layer(h, n_layers - 1, False)
    col = lax.broadcasted_iota(jnp.int32, logits.shape, 1)
    logits = jnp.where(col < nclass, logits, jnp.float32(-1e30))
    m = jnp.max(logits, axis=1, keepdims=True)
    shifted = logits - m
    lse = jnp.log(jnp.sum(jnp.exp(shifted), axis=1, keepdims=True))
    o_ref[...] = (shifted - lse).astype(o_ref.dtype)


# ----------------------------------------------------------------------------
# Wrapper
# ----------------------------------------------------------------------------
def gcn10_forward(x, adj, params):
    """Fused GCN10 forward. params: list of 10 (W, b) pairs, b shape (1, F_out)."""
    n, nfeat = x.shape
    n_layers = len(params)
    nclass = params[-1][0].shape[1]

    # Lane-dense padded feature width shared by every layer; node dim padded
    # to a 128 multiple so adj / activations are dense (8,128) tiles.
    fpad = _round_up(max([nfeat] + [w.shape[1] for (w, _) in params]), LANE)
    npad = _round_up(max(n, 8), LANE)

    # Zero-pad and stack weights / biases: (L, fpad, fpad) bf16, (L, 1, fpad) f32.
    # Padding MUST stay zero so padded hidden columns remain exactly zero.
    w_stack = jnp.zeros((n_layers, fpad, fpad), jnp.bfloat16)
    b_stack = jnp.zeros((n_layers, 1, fpad), jnp.float32)
    for l, (w, b) in enumerate(params):
        fi, fo = w.shape
        w_stack = w_stack.at[l, :fi, :fo].set(w.astype(jnp.bfloat16))
        b_stack = b_stack.at[l, :, :fo].set(b.reshape(1, fo).astype(jnp.float32))

    x_pad = jnp.zeros((npad, fpad), jnp.float32).at[:n, :nfeat].set(
        x.astype(jnp.float32))
    adj_pad = jnp.zeros((npad, npad), jnp.bfloat16).at[:n, :n].set(
        adj.astype(jnp.bfloat16))

    out_pad = pl.pallas_call(
        functools.partial(_gcn10_kernel, n_layers=n_layers, nclass=nclass),
        out_shape=jax.ShapeDtypeStruct((npad, fpad), jnp.float32),
        in_specs=[
            pl.BlockSpec(memory_space=pltpu.MemorySpace.VMEM),  # x
            pl.BlockSpec(memory_space=pltpu.MemorySpace.VMEM),  # adj
            pl.BlockSpec(memory_space=pltpu.MemorySpace.VMEM),  # stacked W
            pl.BlockSpec(memory_space=pltpu.MemorySpace.VMEM),  # stacked b
        ],
        out_specs=pl.BlockSpec(memory_space=pltpu.MemorySpace.VMEM),
    )(x_pad, adj_pad, w_stack, b_stack)

    return out_pad[:n, :nclass]


# ----------------------------------------------------------------------------
# Pure-JAX reference (for correctness checking).
# ----------------------------------------------------------------------------
def gcn10_reference(x, adj, params):
    hp = lax.Precision.HIGHEST
    h = x
    for (w, b) in params[:-1]:
        s = jnp.dot(h, w, precision=hp)
        h = jnp.maximum(jnp.dot(adj, s, precision=hp) + b, 0.0)
    # dropout(training=False) == identity
    w, b = params[-1]
    logits = jnp.dot(adj, jnp.dot(h, w, precision=hp), precision=hp) + b
    return jax.nn.log_softmax(logits, axis=1)


# ----------------------------------------------------------------------------
# Deterministic parameter init (matches GraphConvolution.reset_parameters:
# uniform(-stdv, stdv) with stdv = 1 / sqrt(out_features)).
# ----------------------------------------------------------------------------
def init_params(key, nfeat, nhid, nclass):
    dims = [(nfeat, nhid)] + [(nhid, nhid)] * 8 + [(nhid, nclass)]  # 10 layers
    params = []
    for (fin, fout) in dims:
        key, kw, kb = jax.random.split(key, 3)
        stdv = 1.0 / math.sqrt(fout)
        w = jax.random.uniform(kw, (fin, fout), jnp.float32, -stdv, stdv)
        b = jax.random.uniform(kb, (1, fout), jnp.float32, -stdv, stdv)
        params.append((w, b))
    return params


# ----------------------------------------------------------------------------
if __name__ == "__main__":
    N, NFEAT, NHID, NCLASS = 16, 32, 32, 8

    key = jax.random.PRNGKey(0)
    key, kx, ka = jax.random.split(key, 3)

    x = jax.random.normal(kx, (N, NFEAT), jnp.float32)

    # Simple row-normalized adjacency with self-loops.
    a = (jax.random.uniform(ka, (N, N)) > 0.7).astype(jnp.float32)
    a = jnp.maximum(a, a.T) + jnp.eye(N, dtype=jnp.float32)
    adj = a / jnp.sum(a, axis=1, keepdims=True)

    params = init_params(key, NFEAT, NHID, NCLASS)

    out = jax.jit(gcn10_forward)(x, adj, params)
    jax.block_until_ready(out)

    assert out.shape == (N, NCLASS)
    # log_softmax rows must (log-)sum to ~0 (computed in f32 inside the kernel)
    assert bool(jnp.all(jnp.abs(jax.scipy.special.logsumexp(out, axis=1)) < 1e-3))
    # Match the pure-JAX f32 (HIGHEST precision) reference; tolerance covers
    # the bf16 MXU operands with f32 accumulation across 10 stacked layers.
    ref = gcn10_reference(x, adj, params)
    assert bool(jnp.allclose(out, ref, atol=2e-2, rtol=2e-2)), float(
        jnp.max(jnp.abs(out - ref))
    )

    print("KERNEL_OK")
</pallas_src>

<mosaic_0001>
module attributes {stable_mosaic.version = 11 : i64} {
  func.func @_gcn10_kernel(%arg0: memref<128x128xf32, #tpu.memory_space<vmem>>, %arg1: memref<128x128xbf16, #tpu.memory_space<vmem>>, %arg2: memref<10x128x128xbf16, #tpu.memory_space<vmem>>, %arg3: memref<10x1x128xf32, #tpu.memory_space<vmem>>, %arg4: memref<128x128xf32, #tpu.memory_space<vmem>>) attributes {dimension_semantics = [], scalar_prefetch = 0 : i64, scratch_operands = 0 : i64, tpu.core_type = #tpu.core_type<tc>} {
    %c0 = arith.constant 0 : index
    %c0_0 = arith.constant 0 : index
    %0 = vector.load %arg1[%c0, %c0_0] : memref<128x128xbf16, #tpu.memory_space<vmem>>, vector<128x128xbf16>
    %c0_1 = arith.constant 0 : index
    %c0_2 = arith.constant 0 : index
    %1 = vector.load %arg0[%c0_1, %c0_2] : memref<128x128xf32, #tpu.memory_space<vmem>>, vector<128x128xf32>
    %c0_i32 = arith.constant 0 : i32
    %2 = arith.index_cast %c0_i32 : i32 to index
    %c0_3 = arith.constant 0 : index
    %c0_4 = arith.constant 0 : index
    %3 = vector.load %arg2[%2, %c0_3, %c0_4] : memref<10x128x128xbf16, #tpu.memory_space<vmem>>, vector<1x128x128xbf16>
    %4 = vector.shape_cast %3 : vector<1x128x128xbf16> to vector<128x128xbf16>
    %5 = arith.index_cast %c0_i32 : i32 to index
    %c0_5 = arith.constant 0 : index
    %c0_6 = arith.constant 0 : index
    %6 = vector.load %arg3[%5, %c0_5, %c0_6] : memref<10x1x128xf32, #tpu.memory_space<vmem>>, vector<1x1x128xf32>
    %7 = vector.shape_cast %6 : vector<1x1x128xf32> to vector<1x128xf32>
    %8 = arith.truncf %1 : vector<128x128xf32> to vector<128x128xbf16>
    %cst = arith.constant dense<0.000000e+00> : vector<128x128xf32>
    %9 = tpu.matmul %8, %4, %cst {dimension_numbers = #tpu.dot_dimension_numbers<[1], [0], [0], [1], [0, 0, 1, 1], [], []>} : vector<128x128xbf16>, vector<128x128xbf16>, vector<128x128xf32> -> vector<128x128xf32>
    %10 = arith.truncf %9 : vector<128x128xf32> to vector<128x128xbf16>
    %cst_7 = arith.constant dense<0.000000e+00> : vector<128x128xf32>
    %11 = tpu.matmul %0, %10, %cst_7 {dimension_numbers = #tpu.dot_dimension_numbers<[1], [0], [0], [1], [0, 0, 1, 1], [], []>} : vector<128x128xbf16>, vector<128x128xbf16>, vector<128x128xf32> -> vector<128x128xf32>
    %12 = vector.broadcast %7 : vector<1x128xf32> to vector<128x128xf32>
    %13 = arith.addf %11, %12 : vector<128x128xf32>
    %cst_8 = arith.constant 0.000000e+00 : f32
    %14 = vector.broadcast %cst_8 : f32 to vector<128x128xf32>
    %15 = arith.maximumf %13, %14 : vector<128x128xf32>
    %c1_i32 = arith.constant 1 : i32
    %16 = arith.index_cast %c1_i32 : i32 to index
    %c0_9 = arith.constant 0 : index
    %c0_10 = arith.constant 0 : index
    %17 = vector.load %arg2[%16, %c0_9, %c0_10] : memref<10x128x128xbf16, #tpu.memory_space<vmem>>, vector<1x128x128xbf16>
    %18 = vector.shape_cast %17 : vector<1x128x128xbf16> to vector<128x128xbf16>
    %19 = arith.index_cast %c1_i32 : i32 to index
    %c0_11 = arith.constant 0 : index
    %c0_12 = arith.constant 0 : index
    %20 = vector.load %arg3[%19, %c0_11, %c0_12] : memref<10x1x128xf32, #tpu.memory_space<vmem>>, vector<1x1x128xf32>
    %21 = vector.shape_cast %20 : vector<1x1x128xf32> to vector<1x128xf32>
    %22 = arith.truncf %15 : vector<128x128xf32> to vector<128x128xbf16>
    %cst_13 = arith.constant dense<0.000000e+00> : vector<128x128xf32>
    %23 = tpu.matmul %22, %18, %cst_13 {dimension_numbers = #tpu.dot_dimension_numbers<[1], [0], [0], [1], [0, 0, 1, 1], [], []>} : vector<128x128xbf16>, vector<128x128xbf16>, vector<128x128xf32> -> vector<128x128xf32>
    %24 = arith.truncf %23 : vector<128x128xf32> to vector<128x128xbf16>
    %cst_14 = arith.constant dense<0.000000e+00> : vector<128x128xf32>
    %25 = tpu.matmul %0, %24, %cst_14 {dimension_numbers = #tpu.dot_dimension_numbers<[1], [0], [0], [1], [0, 0, 1, 1], [], []>} : vector<128x128xbf16>, vector<128x128xbf16>, vector<128x128xf32> -> vector<128x128xf32>
    %26 = vector.broadcast %21 : vector<1x128xf32> to vector<128x128xf32>
    %27 = arith.addf %25, %26 : vector<128x128xf32>
    %cst_15 = arith.constant 0.000000e+00 : f32
    %28 = vector.broadcast %cst_15 : f32 to vector<128x128xf32>
    %29 = arith.maximumf %27, %28 : vector<128x128xf32>
    %c2_i32 = arith.constant 2 : i32
    %30 = arith.index_cast %c2_i32 : i32 to index
    %c0_16 = arith.constant 0 : index
    %c0_17 = arith.constant 0 : index
    %31 = vector.load %arg2[%30, %c0_16, %c0_17] : memref<10x128x128xbf16, #tpu.memory_space<vmem>>, vector<1x128x128xbf16>
    %32 = vector.shape_cast %31 : vector<1x128x128xbf16> to vector<128x128xbf16>
    %33 = arith.index_cast %c2_i32 : i32 to index
    %c0_18 = arith.constant 0 : index
    %c0_19 = arith.constant 0 : index
    %34 = vector.load %arg3[%33, %c0_18, %c0_19] : memref<10x1x128xf32, #tpu.memory_space<vmem>>, vector<1x1x128xf32>
    %35 = vector.shape_cast %34 : vector<1x1x128xf32> to vector<1x128xf32>
    %36 = arith.truncf %29 : vector<128x128xf32> to vector<128x128xbf16>
    %cst_20 = arith.constant dense<0.000000e+00> : vector<128x128xf32>
    %37 = tpu.matmul %36, %32, %cst_20 {dimension_numbers = #tpu.dot_dimension_numbers<[1], [0], [0], [1], [0, 0, 1, 1], [], []>} : vector<128x128xbf16>, vector<128x128xbf16>, vector<128x128xf32> -> vector<128x128xf32>
    %38 = arith.truncf %37 : vector<128x128xf32> to vector<128x128xbf16>
    %cst_21 = arith.constant dense<0.000000e+00> : vector<128x128xf32>
    %39 = tpu.matmul %0, %38, %cst_21 {dimension_numbers = #tpu.dot_dimension_numbers<[1], [0], [0], [1], [0, 0, 1, 1], [], []>} : vector<128x128xbf16>, vector<128x128xbf16>, vector<128x128xf32> -> vector<128x128xf32>
    %40 = vector.broadcast %35 : vector<1x128xf32> to vector<128x128xf32>
    %41 = arith.addf %39, %40 : vector<128x128xf32>
    %cst_22 = arith.constant 0.000000e+00 : f32
    %42 = vector.broadcast %cst_22 : f32 to vector<128x128xf32>
    %43 = arith.maximumf %41, %42 : vector<128x128xf32>
    %c3_i32 = arith.constant 3 : i32
    %44 = arith.index_cast %c3_i32 : i32 to index
    %c0_23 = arith.constant 0 : index
    %c0_24 = arith.constant 0 : index
    %45 = vector.load %arg2[%44, %c0_23, %c0_24] : memref<10x128x128xbf16, #tpu.memory_space<vmem>>, vector<1x128x128xbf16>
    %46 = vector.shape_cast %45 : vector<1x128x128xbf16> to vector<128x128xbf16>
    %47 = arith.index_cast %c3_i32 : i32 to index
    %c0_25 = arith.constant 0 : index
    %c0_26 = arith.constant 0 : index
    %48 = vector.load %arg3[%47, %c0_25, %c0_26] : memref<10x1x128xf32, #tpu.memory_space<vmem>>, vector<1x1x128xf32>
    %49 = vector.shape_cast %48 : vector<1x1x128xf32> to vector<1x128xf32>
    %50 = arith.truncf %43 : vector<128x128xf32> to vector<128x128xbf16>
    %cst_27 = arith.constant dense<0.000000e+00> : vector<128x128xf32>
    %51 = tpu.matmul %50, %46, %cst_27 {dimension_numbers = #tpu.dot_dimension_numbers<[1], [0], [0], [1], [0, 0, 1, 1], [], []>} : vector<128x128xbf16>, vector<128x128xbf16>, vector<128x128xf32> -> vector<128x128xf32>
    %52 = arith.truncf %51 : vector<128x128xf32> to vector<128x128xbf16>
    %cst_28 = arith.constant dense<0.000000e+00> : vector<128x128xf32>
    %53 = tpu.matmul %0, %52, %cst_28 {dimension_numbers = #tpu.dot_dimension_numbers<[1], [0], [0], [1], [0, 0, 1, 1], [], []>} : vector<128x128xbf16>, vector<128x128xbf16>, vector<128x128xf32> -> vector<128x128xf32>
    %54 = vector.broadcast %49 : vector<1x128xf32> to vector<128x128xf32>
    %55 = arith.addf %53, %54 : vector<128x128xf32>
    %cst_29 = arith.constant 0.000000e+00 : f32
    %56 = vector.broadcast %cst_29 : f32 to vector<128x128xf32>
    %57 = arith.maximumf %55, %56 : vector<128x128xf32>
    %c4_i32 = arith.constant 4 : i32
    %58 = arith.index_cast %c4_i32 : i32 to index
    %c0_30 = arith.constant 0 : index
    %c0_31 = arith.constant 0 : index
    %59 = vector.load %arg2[%58, %c0_30, %c0_31] : memref<10x128x128xbf16, #tpu.memory_space<vmem>>, vector<1x128x128xbf16>
    %60 = vector.shape_cast %59 : vector<1x128x128xbf16> to vector<128x128xbf16>
    %61 = arith.index_cast %c4_i32 : i32 to index
    %c0_32 = arith.constant 0 : index
    %c0_33 = arith.constant 0 : index
    %62 = vector.load %arg3[%61, %c0_32, %c0_33] : memref<10x1x128xf32, #tpu.memory_space<vmem>>, vector<1x1x128xf32>
    %63 = vector.shape_cast %62 : vector<1x1x128xf32> to vector<1x128xf32>
    %64 = arith.truncf %57 : vector<128x128xf32> to vector<128x128xbf16>
    %cst_34 = arith.constant dense<0.000000e+00> : vector<128x128xf32>
    %65 = tpu.matmul %64, %60, %cst_34 {dimension_numbers = #tpu.dot_dimension_numbers<[1], [0], [0], [1], [0, 0, 1, 1], [], []>} : vector<128x128xbf16>, vector<128x128xbf16>, vector<128x128xf32> -> vector<128x128xf32>
    %66 = arith.truncf %65 : vector<128x128xf32> to vector<128x128xbf16>
    %cst_35 = arith.constant dense<0.000000e+00> : vector<128x128xf32>
    %67 = tpu.matmul %0, %66, %cst_35 {dimension_numbers = #tpu.dot_dimension_numbers<[1], [0], [0], [1], [0, 0, 1, 1], [], []>} : vector<128x128xbf16>, vector<128x128xbf16>, vector<128x128xf32> -> vector<128x128xf32>
    %68 = vector.broadcast %63 : vector<1x128xf32> to vector<128x128xf32>
    %69 = arith.addf %67, %68 : vector<128x128xf32>
    %cst_36 = arith.constant 0.000000e+00 : f32
    %70 = vector.broadcast %cst_36 : f32 to vector<128x128xf32>
    %71 = arith.maximumf %69, %70 : vector<128x128xf32>
    %c5_i32 = arith.constant 5 : i32
    %72 = arith.index_cast %c5_i32 : i32 to index
    %c0_37 = arith.constant 0 : index
    %c0_38 = arith.constant 0 : index
    %73 = vector.load %arg2[%72, %c0_37, %c0_38] : memref<10x128x128xbf16, #tpu.memory_space<vmem>>, vector<1x128x128xbf16>
    %74 = vector.shape_cast %73 : vector<1x128x128xbf16> to vector<128x128xbf16>
    %75 = arith.index_cast %c5_i32 : i32 to index
    %c0_39 = arith.constant 0 : index
    %c0_40 = arith.constant 0 : index
    %76 = vector.load %arg3[%75, %c0_39, %c0_40] : memref<10x1x128xf32, #tpu.memory_space<vmem>>, vector<1x1x128xf32>
    %77 = vector.shape_cast %76 : vector<1x1x128xf32> to vector<1x128xf32>
    %78 = arith.truncf %71 : vector<128x128xf32> to vector<128x128xbf16>
    %cst_41 = arith.constant dense<0.000000e+00> : vector<128x128xf32>
    %79 = tpu.matmul %78, %74, %cst_41 {dimension_numbers = #tpu.dot_dimension_numbers<[1], [0], [0], [1], [0, 0, 1, 1], [], []>} : vector<128x128xbf16>, vector<128x128xbf16>, vector<128x128xf32> -> vector<128x128xf32>
    %80 = arith.truncf %79 : vector<128x128xf32> to vector<128x128xbf16>
    %cst_42 = arith.constant dense<0.000000e+00> : vector<128x128xf32>
    %81 = tpu.matmul %0, %80, %cst_42 {dimension_numbers = #tpu.dot_dimension_numbers<[1], [0], [0], [1], [0, 0, 1, 1], [], []>} : vector<128x128xbf16>, vector<128x128xbf16>, vector<128x128xf32> -> vector<128x128xf32>
    %82 = vector.broadcast %77 : vector<1x128xf32> to vector<128x128xf32>
    %83 = arith.addf %81, %82 : vector<128x128xf32>
    %cst_43 = arith.constant 0.000000e+00 : f32
    %84 = vector.broadcast %cst_43 : f32 to vector<128x128xf32>
    %85 = arith.maximumf %83, %84 : vector<128x128xf32>
    %c6_i32 = arith.constant 6 : i32
    %86 = arith.index_cast %c6_i32 : i32 to index
    %c0_44 = arith.constant 0 : index
    %c0_45 = arith.constant 0 : index
    %87 = vector.load %arg2[%86, %c0_44, %c0_45] : memref<10x128x128xbf16, #tpu.memory_space<vmem>>, vector<1x128x128xbf16>
    %88 = vector.shape_cast %87 : vector<1x128x128xbf16> to vector<128x128xbf16>
    %89 = arith.index_cast %c6_i32 : i32 to index
    %c0_46 = arith.constant 0 : index
    %c0_47 = arith.constant 0 : index
    %90 = vector.load %arg3[%89, %c0_46, %c0_47] : memref<10x1x128xf32, #tpu.memory_space<vmem>>, vector<1x1x128xf32>
    %91 = vector.shape_cast %90 : vector<1x1x128xf32> to vector<1x128xf32>
    %92 = arith.truncf %85 : vector<128x128xf32> to vector<128x128xbf16>
    %cst_48 = arith.constant dense<0.000000e+00> : vector<128x128xf32>
    %93 = tpu.matmul %92, %88, %cst_48 {dimension_numbers = #tpu.dot_dimension_numbers<[1], [0], [0], [1], [0, 0, 1, 1], [], []>} : vector<128x128xbf16>, vector<128x128xbf16>, vector<128x128xf32> -> vector<128x128xf32>
    %94 = arith.truncf %93 : vector<128x128xf32> to vector<128x128xbf16>
    %cst_49 = arith.constant dense<0.000000e+00> : vector<128x128xf32>
    %95 = tpu.matmul %0, %94, %cst_49 {dimension_numbers = #tpu.dot_dimension_numbers<[1], [0], [0], [1], [0, 0, 1, 1], [], []>} : vector<128x128xbf16>, vector<128x128xbf16>, vector<128x128xf32> -> vector<128x128xf32>
    %96 = vector.broadcast %91 : vector<1x128xf32> to vector<128x128xf32>
    %97 = arith.addf %95, %96 : vector<128x128xf32>
    %cst_50 = arith.constant 0.000000e+00 : f32
    %98 = vector.broadcast %cst_50 : f32 to vector<128x128xf32>
    %99 = arith.maximumf %97, %98 : vector<128x128xf32>
    %c7_i32 = arith.constant 7 : i32
    %100 = arith.index_cast %c7_i32 : i32 to index
    %c0_51 = arith.constant 0 : index
    %c0_52 = arith.constant 0 : index
    %101 = vector.load %arg2[%100, %c0_51, %c0_52] : memref<10x128x128xbf16, #tpu.memory_space<vmem>>, vector<1x128x128xbf16>
    %102 = vector.shape_cast %101 : vector<1x128x128xbf16> to vector<128x128xbf16>
    %103 = arith.index_cast %c7_i32 : i32 to index
    %c0_53 = arith.constant 0 : index
    %c0_54 = arith.constant 0 : index
    %104 = vector.load %arg3[%103, %c0_53, %c0_54] : memref<10x1x128xf32, #tpu.memory_space<vmem>>, vector<1x1x128xf32>
    %105 = vector.shape_cast %104 : vector<1x1x128xf32> to vector<1x128xf32>
    %106 = arith.truncf %99 : vector<128x128xf32> to vector<128x128xbf16>
    %cst_55 = arith.constant dense<0.000000e+00> : vector<128x128xf32>
    %107 = tpu.matmul %106, %102, %cst_55 {dimension_numbers = #tpu.dot_dimension_numbers<[1], [0], [0], [1], [0, 0, 1, 1], [], []>} : vector<128x128xbf16>, vector<128x128xbf16>, vector<128x128xf32> -> vector<128x128xf32>
    %108 = arith.truncf %107 : vector<128x128xf32> to vector<128x128xbf16>
    %cst_56 = arith.constant dense<0.000000e+00> : vector<128x128xf32>
    %109 = tpu.matmul %0, %108, %cst_56 {dimension_numbers = #tpu.dot_dimension_numbers<[1], [0], [0], [1], [0, 0, 1, 1], [], []>} : vector<128x128xbf16>, vector<128x128xbf16>, vector<128x128xf32> -> vector<128x128xf32>
    %110 = vector.broadcast %105 : vector<1x128xf32> to vector<128x128xf32>
    %111 = arith.addf %109, %110 : vector<128x128xf32>
    %cst_57 = arith.constant 0.000000e+00 : f32
    %112 = vector.broadcast %cst_57 : f32 to vector<128x128xf32>
    %113 = arith.maximumf %111, %112 : vector<128x128xf32>
    %c8_i32 = arith.constant 8 : i32
    %114 = arith.index_cast %c8_i32 : i32 to index
    %c0_58 = arith.constant 0 : index
    %c0_59 = arith.constant 0 : index
    %115 = vector.load %arg2[%114, %c0_58, %c0_59] : memref<10x128x128xbf16, #tpu.memory_space<vmem>>, vector<1x128x128xbf16>
    %116 = vector.shape_cast %115 : vector<1x128x128xbf16> to vector<128x128xbf16>
    %117 = arith.index_cast %c8_i32 : i32 to index
    %c0_60 = arith.constant 0 : index
    %c0_61 = arith.constant 0 : index
    %118 = vector.load %arg3[%117, %c0_60, %c0_61] : memref<10x1x128xf32, #tpu.memory_space<vmem>>, vector<1x1x128xf32>
    %119 = vector.shape_cast %118 : vector<1x1x128xf32> to vector<1x128xf32>
    %120 = arith.truncf %113 : vector<128x128xf32> to vector<128x128xbf16>
    %cst_62 = arith.constant dense<0.000000e+00> : vector<128x128xf32>
    %121 = tpu.matmul %120, %116, %cst_62 {dimension_numbers = #tpu.dot_dimension_numbers<[1], [0], [0], [1], [0, 0, 1, 1], [], []>} : vector<128x128xbf16>, vector<128x128xbf16>, vector<128x128xf32> -> vector<128x128xf32>
    %122 = arith.truncf %121 : vector<128x128xf32> to vector<128x128xbf16>
    %cst_63 = arith.constant dense<0.000000e+00> : vector<128x128xf32>
    %123 = tpu.matmul %0, %122, %cst_63 {dimension_numbers = #tpu.dot_dimension_numbers<[1], [0], [0], [1], [0, 0, 1, 1], [], []>} : vector<128x128xbf16>, vector<128x128xbf16>, vector<128x128xf32> -> vector<128x128xf32>
    %124 = vector.broadcast %119 : vector<1x128xf32> to vector<128x128xf32>
    %125 = arith.addf %123, %124 : vector<128x128xf32>
    %cst_64 = arith.constant 0.000000e+00 : f32
    %126 = vector.broadcast %cst_64 : f32 to vector<128x128xf32>
    %127 = arith.maximumf %125, %126 : vector<128x128xf32>
    %c9_i32 = arith.constant 9 : i32
    %c9 = arith.constant 9 : index
    %c0_65 = arith.constant 0 : index
    %c0_66 = arith.constant 0 : index
    %128 = vector.load %arg2[%c9, %c0_65, %c0_66] : memref<10x128x128xbf16, #tpu.memory_space<vmem>>, vector<1x128x128xbf16>
    %129 = vector.shape_cast %128 : vector<1x128x128xbf16> to vector<128x128xbf16>
    %c9_67 = arith.constant 9 : index
    %c0_68 = arith.constant 0 : index
    %c0_69 = arith.constant 0 : index
    %130 = vector.load %arg3[%c9_67, %c0_68, %c0_69] : memref<10x1x128xf32, #tpu.memory_space<vmem>>, vector<1x1x128xf32>
    %131 = vector.shape_cast %130 : vector<1x1x128xf32> to vector<1x128xf32>
    %132 = arith.truncf %127 : vector<128x128xf32> to vector<128x128xbf16>
    %cst_70 = arith.constant dense<0.000000e+00> : vector<128x128xf32>
    %133 = tpu.matmul %132, %129, %cst_70 {dimension_numbers = #tpu.dot_dimension_numbers<[1], [0], [0], [1], [0, 0, 1, 1], [], []>} : vector<128x128xbf16>, vector<128x128xbf16>, vector<128x128xf32> -> vector<128x128xf32>
    %134 = arith.truncf %133 : vector<128x128xf32> to vector<128x128xbf16>
    %cst_71 = arith.constant dense<0.000000e+00> : vector<128x128xf32>
    %135 = tpu.matmul %0, %134, %cst_71 {dimension_numbers = #tpu.dot_dimension_numbers<[1], [0], [0], [1], [0, 0, 1, 1], [], []>} : vector<128x128xbf16>, vector<128x128xbf16>, vector<128x128xf32> -> vector<128x128xf32>
    %136 = vector.broadcast %131 : vector<1x128xf32> to vector<128x128xf32>
    %137 = arith.addf %135, %136 : vector<128x128xf32>
    %138 = tpu.iota {dimensions = array<i32: 1>} : vector<128x128xi32>
    %c8_i32_72 = arith.constant 8 : i32
    %139 = vector.broadcast %c8_i32_72 : i32 to vector<128x128xi32>
    %140 = arith.cmpi slt, %138, %139 : vector<128x128xi32>
    %cst_73 = arith.constant -1.000000e+30 : f32
    %141 = vector.broadcast %cst_73 : f32 to vector<128x128xf32>
    %142 = arith.select %140, %137, %141 : vector<128x128xi1>, vector<128x128xf32>
    %cst_74 = arith.constant dense<0xFF800000> : vector<128xf32>
    %143 = vector.multi_reduction <maximumf>, %142, %cst_74 [1] : vector<128x128xf32> to vector<128xf32>
    %144 = vector.shape_cast %143 : vector<128xf32> to vector<128x1xf32>
    %145 = vector.broadcast %144 : vector<128x1xf32> to vector<128x128xf32>
    %146 = arith.subf %142, %145 : vector<128x128xf32>
    %147 = math.exp %146 : vector<128x128xf32>
    %cst_75 = arith.constant dense<0.000000e+00> : vector<128xf32>
    %148 = vector.multi_reduction <add>, %147, %cst_75 [1] : vector<128x128xf32> to vector<128xf32>
    %149 = vector.shape_cast %148 : vector<128xf32> to vector<128x1xf32>
    %150 = math.log %149 : vector<128x1xf32>
    %151 = vector.broadcast %150 : vector<128x1xf32> to vector<128x128xf32>
    %152 = arith.subf %146, %151 : vector<128x128xf32>
    %c0_76 = arith.constant 0 : index
    %c0_77 = arith.constant 0 : index
    %153 = vector.load %arg4[%c0_76, %c0_77] : memref<128x128xf32, #tpu.memory_space<vmem>>, vector<128x128xf32>
    tpu.vector_store %arg4[%c0_76, %c0_77], %152 {strides = array<i32>} : memref<128x128xf32, #tpu.memory_space<vmem>>, vector<128x128xf32>,
    return
  }
}

</mosaic_0001>

<bundles_post_ra>
// kernel: gcn10_forward.1
= control target key start
LH: loop header
LB: loop body
LE: loop exit
PB: predicated region body
PF: predicated region fallthrough
CT: control target
= control target key end

     0   :  { %s5359_s2 = inlined_call_operand.vmem [shape: bf16[10,128,128], index: 2, kind: input, shape index: {}]   ;;  %s5360_s0 = inlined_call_operand.vmem [shape: f32[128,128], index: 0, kind: input, shape index: {}]   ;;  %s5361_s1 = inlined_call_operand.vmem [shape: bf16[128,128], index: 1, kind: input, shape index: {}]   ;;  %s5362_s3 = inlined_call_operand.vmem [shape: f32[10,1,128], index: 3, kind: input, shape index: {}]   ;;  %s5363_s4 = inlined_call_operand.vmem [shape: f32[128,128], index: 4, kind: output, shape index: {}]  }
   0x1   :  { %v4480_v0 = vld [vmem:[%s5359_s2 + $0x38] sm:$0xff]   ;;  %v4481_v1 = vld [vmem:[%s5359_s2 + $0x30] sm:$0xff]   ;;  %v4482_v2 = vld [vmem:[%s5359_s2 + $0x28] sm:$0xff]  }
   0x2   :  { %3840 = vmatprep.subr.bf16.mxu0 %v4480_v0  ;;  %v4483_v3 = vld [vmem:[%s5359_s2 + $0x20] sm:$0xff]   ;;  %v35_v5 = vld [vmem:[%s5360_s0 + $0x8] sm:$0xff]  ;;  %v4484_v7 = vld [vmem:[%s5359_s2 + $0x18] sm:$0xff]  }
   0x3   :  { %3841 = vmatpush3.bf16.msra.mxu0 %v4480_v0  ;;  %v34_v4 = vld [vmem:[%s5360_s0] sm:$0xff]  ;;  %v4485_v8 = vld [vmem:[%s5359_s2 + $0x10] sm:$0xff]   ;;  %v4486_v9 = vld [vmem:[%s5359_s2 + $0x8] sm:$0xff]  }
   0x4   :  { %3842 = vmatprep.subr.bf16.mxu0 %v4481_v1  ;;  %v67_v6 = vpack.c.bf16 %v35_v5, %v34_v4  ;;  %v4487_v10 = vld [vmem:[%s5359_s2] sm:$0xff]   ;;  %v36_v11 = vld [vmem:[%s5360_s0 + $0x10] sm:$0xff]  ;;  %v37_v12 = vld [vmem:[%s5360_s0 + $0x18] sm:$0xff] }
   0x5   :  { %v38_v13 = vld [vmem:[%s5360_s0 + $0x20] sm:$0xff]  ;;  %v39_v14 = vld [vmem:[%s5360_s0 + $0x28] sm:$0xff]  ;;  %v68_v15 = vpack.c.bf16 %v37_v12, %v36_v11  ;;  %v40_v17 = vld [vmem:[%s5360_s0 + $0x30] sm:$0xff] }
   0x6   :  { %3856 = vmatprep.mubr.bf16.mxu0 %v67_v6  ;;  %v69_v16 = vpack.c.bf16 %v39_v14, %v38_v13  ;;  %v41_v18 = vld [vmem:[%s5360_s0 + $0x38] sm:$0xff]  ;;  %v42_v19 = vld [vmem:[%s5360_s0 + $0x40] sm:$0xff]  ;;  %v43_v20 = vld [vmem:[%s5360_s0 + $0x48] sm:$0xff] }
   0x7   :  { %3843 = vmatpush3.bf16.msra.mxu0 %v4481_v1  ;;  %v70_v21 = vpack.c.bf16 %v41_v18, %v40_v17  ;;  %v71_v22 = vpack.c.bf16 %v43_v20, %v42_v19  ;;  %v44_v23 = vld [vmem:[%s5360_s0 + $0x50] sm:$0xff]  ;;  %v45_v24 = vld [vmem:[%s5360_s0 + $0x58] sm:$0xff]  ;;  %v46_v25 = vld [vmem:[%s5360_s0 + $0x60] sm:$0xff] }
   0x8   :  { %3844 = vmatprep.subr.bf16.mxu0 %v4482_v2  ;;  %v47_v26 = vld [vmem:[%s5360_s0 + $0x68] sm:$0xff]  ;;  %v72_v27 = vpack.c.bf16 %v45_v24, %v44_v23  ;;  %v48_v29 = vld [vmem:[%s5360_s0 + $0x70] sm:$0xff]  ;;  %v49_v30 = vld [vmem:[%s5360_s0 + $0x78] sm:$0xff] }
   0x9   :  { %v73_v28 = vpack.c.bf16 %v47_v26, %v46_v25  ;;  %v74_v31 = vpack.c.bf16 %v49_v30, %v48_v29  ;;  %v4748_v32 = vld [vmem:[%s5361_s1] sm:$0xff]   ;;  %v4496_v33 = vld [vmem:[%s5359_s2 + $0x78] sm:$0xff]   ;;  %v4497_v34 = vld [vmem:[%s5359_s2 + $0x70] sm:$0xff]  }
   0xa   :  { %3888 = vmatprep.mubr.bf16.mxu1 %v4748_v32  ;;  %v4498_v35 = vld [vmem:[%s5359_s2 + $0x68] sm:$0xff]   ;;  %v4499_v36 = vld [vmem:[%s5359_s2 + $0x60] sm:$0xff]   ;;  %v4500_v37 = vld [vmem:[%s5359_s2 + $0x58] sm:$0xff]  }
   0xb   :  { %3845 = vmatpush3.bf16.msra.mxu0 %v4482_v2  ;;  %v4769_v62 = vld [vmem:[%s5361_s1 + $0x8] sm:$0xff]   ;;  %v4774_v63 = vld [vmem:[%s5361_s1 + $0x10] sm:$0xff]   ;;  %v4781_v0 = vld [vmem:[%s5361_s1 + $0x18] sm:$0xff]  }
   0xc   :  { %3846 = vmatprep.subr.bf16.mxu0 %v4483_v3  ;;  %v4786_v1 = vld [vmem:[%s5361_s1 + $0x20] sm:$0xff]   ;;  %v4793_v2 = vld [vmem:[%s5361_s1 + $0x28] sm:$0xff]   ;;  %v4805_v4 = vld [vmem:[%s5361_s1 + $0x38] sm:$0xff]  }
   0xd   :  { %v4501_v5 = vld [vmem:[%s5359_s2 + $0x50] sm:$0xff]   ;;  %v4502_v6 = vld [vmem:[%s5359_s2 + $0x48] sm:$0xff]  }
   0xf   :  { %3847 = vmatpush3.bf16.msra.mxu0 %v4483_v3  ;;  %v4798_v3 = vld [vmem:[%s5361_s1 + $0x30] sm:$0xff]  }
  0x10   :  { %3848 = vmatprep.subr.bf16.mxu0 %v4484_v7 }
  0x13   :  { %3849 = vmatpush3.bf16.msra.mxu0 %v4484_v7  ;;  %v4503_v7 = vld [vmem:[%s5359_s2 + $0x40] sm:$0xff]  }
  0x14   :  { %3850 = vmatprep.subr.bf16.mxu0 %v4485_v8 }
  0x17   :  { %3851 = vmatpush3.bf16.msra.mxu0 %v4485_v8 }
  0x18   :  { %3852 = vmatprep.subr.bf16.mxu0 %v4486_v9 }
  0x1b   :  { %3853 = vmatpush3.bf16.msra.mxu0 %v4486_v9 }
  0x1c   :  { %3854 = vmatprep.subr.bf16.mxu0 %v4487_v10 }
  0x1f   :  { %3855 = vmatpush3.bf16.msra.mxu0 %v4487_v10  ;;  %v3277_v10 = vld [vmem:[%s5362_s3] ss:$0 sm:$0xff] }
  0x20   :  { %3904 = vmatprep.subr.bf16.mxu0 %v4496_v33 }
  0x22   :  { %3857 = vmatmul.mubr.bf16.vlgmr.msra.gmra.mxu0 %v68_v15 }
  0x23   :  { %3860 = vmatprep.mubr.bf16.mxu0 %v69_v16  ;;  %3905 = vmatpush3.bf16.msra.mxu0 %v4496_v33 }
  0x24   :  { %3906 = vmatprep.subr.bf16.mxu0 %v4497_v34 }
  0x27   :  { %3907 = vmatpush3.bf16.msra.mxu0 %v4497_v34 }
  0x28   :  { %3908 = vmatprep.subr.bf16.mxu0 %v4498_v35 }
  0x2a   :  { %3861 = vmatmul.mubr.bf16.gmra.mxu0 %v70_v21 }
  0x2b   :  { %3864 = vmatprep.mubr.bf16.mxu0 %v71_v22  ;;  %3909 = vmatpush3.bf16.msra.mxu0 %v4498_v35 }
  0x2c   :  { %3910 = vmatprep.subr.bf16.mxu0 %v4499_v36 }
  0x2f   :  { %3911 = vmatpush3.bf16.msra.mxu0 %v4499_v36 }
  0x30   :  { %3912 = vmatprep.subr.bf16.mxu0 %v4500_v37 }
  0x32   :  { %3865 = vmatmul.mubr.bf16.gmra.mxu0 %v72_v27 }
  0x33   :  { %3868 = vmatprep.mubr.bf16.mxu0 %v73_v28  ;;  %3913 = vmatpush3.bf16.msra.mxu0 %v4500_v37 }
  0x34   :  { %3914 = vmatprep.subr.bf16.mxu0 %v4501_v5 }
  0x37   :  { %3915 = vmatpush3.bf16.msra.mxu0 %v4501_v5 }
  0x38   :  { %3916 = vmatprep.subr.bf16.mxu0 %v4502_v6 }
  0x3a   :  { %3869 = vmatmul.mubr.bf16.gmra.mxu0 %v74_v31 }
  0x3b   :  { %3917 = vmatpush3.bf16.msra.mxu0 %v4502_v6 }
  0x3c   :  { %3918 = vmatprep.subr.bf16.mxu0 %v4503_v7 }
  0x3f   :  { %3919 = vmatpush3.bf16.msra.mxu0 %v4503_v7 }
  0xe2   :  { %v3858_v38 = vpop.f32.mrf.mxu0 }
  0xe4   :  { %v157_v39 = vpop.f32.mrf.mxu0 }
  0xe6   :  { %v3859_v40 = vpop.f32.mrf.mxu0 }
  0xe7   :  { %v221_v60 = vpack.c.bf16 %v3859_v40, %v3858_v38 }
  0xe8   :  { %v160_v41 = vpop.f32.mrf.mxu0 }
  0xe9   :  { %v220_v61 = vpack.c.bf16 %v160_v41, %v157_v39 }
  0xea   :  { %v3862_v42 = vpop.f32.mrf.mxu0 }
  0xec   :  { %v173_v43 = vpop.f32.mrf.mxu0 }
  0xee   :  { %v3863_v44 = vpop.f32.mrf.mxu0 }
  0xef   :  { %v223_v58 = vpack.c.bf16 %v3863_v44, %v3862_v42 }
  0xf0   :  { %v176_v45 = vpop.f32.mrf.mxu0 }
  0xf1   :  { %v222_v59 = vpack.c.bf16 %v176_v45, %v173_v43 }
  0xf2   :  { %v3866_v46 = vpop.f32.mrf.mxu0 }
  0xf4   :  { %v189_v47 = vpop.f32.mrf.mxu0 }
  0xf6   :  { %v3867_v48 = vpop.f32.mrf.mxu0 }
  0xf7   :  { %v225_v56 = vpack.c.bf16 %v3867_v48, %v3866_v46 }
  0xf8   :  { %v192_v49 = vpop.f32.mrf.mxu0 }
  0xf9   :  { %v224_v57 = vpack.c.bf16 %v192_v49, %v189_v47 }
  0xfa   :  { %v3870_v50 = vpop.f32.mrf.mxu0 }
  0xfc   :  { %v205_v51 = vpop.f32.mrf.mxu0 }
  0xfe   :  { %v3871_v52 = vpop.f32.mrf.mxu0 }
  0xff   :  { %v227_v53 = vpack.c.bf16 %v3871_v52, %v3870_v50 }
 0x100   :  { %v208_v54 = vpop.f32.mrf.mxu0 }
 0x101   :  { %v226_v55 = vpack.c.bf16 %v208_v54, %v205_v51  ;;  %3872 = vmatprep.subr.bf16.mxu1 %v227_v53 }
 0x102   :  { %3873 = vmatpush3.bf16.msra.mxu1 %v227_v53 }
 0x103   :  { %3874 = vmatprep.subr.bf16.mxu1 %v226_v55 }
 0x106   :  { %3875 = vmatpush3.bf16.msra.mxu1 %v226_v55 }
 0x107   :  { %3876 = vmatprep.subr.bf16.mxu1 %v225_v56 }
 0x10a   :  { %3877 = vmatpush3.bf16.msra.mxu1 %v225_v56 }
 0x10b   :  { %3878 = vmatprep.subr.bf16.mxu1 %v224_v57 }
 0x10e   :  { %3879 = vmatpush3.bf16.msra.mxu1 %v224_v57 }
 0x10f   :  { %3880 = vmatprep.subr.bf16.mxu1 %v223_v58 }
 0x112   :  { %3881 = vmatpush3.bf16.msra.mxu1 %v223_v58 }
 0x113   :  { %3882 = vmatprep.subr.bf16.mxu1 %v222_v59 }
 0x116   :  { %3883 = vmatpush3.bf16.msra.mxu1 %v222_v59 }
 0x117   :  { %3884 = vmatprep.subr.bf16.mxu1 %v221_v60 }
 0x11a   :  { %3885 = vmatpush3.bf16.msra.mxu1 %v221_v60 }
 0x11b   :  { %3886 = vmatprep.subr.bf16.mxu1 %v220_v61 }
 0x11e   :  { %3887 = vmatpush3.bf16.msra.mxu1 %v220_v61 }
 0x121   :  { %3889 = vmatmul.mubr.bf16.vlgmr.msra.gmra.mxu1 %v4769_v62 }
 0x122   :  { %3892 = vmatprep.mubr.bf16.mxu1 %v4774_v63 }
 0x129   :  { %3893 = vmatmul.mubr.bf16.gmra.mxu1 %v4781_v0 }
 0x12a   :  { %3896 = vmatprep.mubr.bf16.mxu1 %v4786_v1 }
 0x131   :  { %3897 = vmatmul.mubr.bf16.gmra.mxu1 %v4793_v2 }
 0x132   :  { %3900 = vmatprep.mubr.bf16.mxu1 %v4798_v3 }
 0x139   :  { %3901 = vmatmul.mubr.bf16.gmra.mxu1 %v4805_v4 }
 0x13a   :  { %3952 = vmatprep.mubr.bf16.mxu1 %v4748_v32 }
 0x1e1   :  { %v3890_v8 = vpop.f32.mrf.mxu1 }
 0x1e2   :  { %v325_v14 = vadd.f32 %v3890_v8, %v3277_v10 }
 0x1e3   :  { %v316_v9 = vpop.f32.mrf.mxu1 }
 0x1e4   :  { %v317_v12 = vadd.f32 %v3277_v10, %v316_v9  ;;  %v381_v21 = vmax.f32 %v325_v14, 0.0  ;;  %v4504_v9 = vld [vmem:[%s5359_s2 + $0xb8] sm:$0xff]  }
 0x1e5   :  { %v3891_v11 = vpop.f32.mrf.mxu1  ;;  %3968 = vmatprep.subr.bf16.mxu0 %v4504_v9 }
 0x1e6   :  { %v328_v13 = vadd.f32 %v3891_v11, %v3277_v10  ;;  %v379_v19 = vmax.f32 %v317_v12, 0.0  ;;  %v4505_v11 = vld [vmem:[%s5359_s2 + $0xb0] sm:$0xff]   ;;  %v4507_v12 = vld [vmem:[%s5359_s2 + $0xa0] sm:$0xff]  }
 0x1e7   :  { %v319_v15 = vpop.f32.mrf.mxu1 }
 0x1e8   :  { %v320_v16 = vadd.f32 %v3277_v10, %v319_v15  ;;  %v382_v17 = vmax.f32 %v328_v13, 0.0  ;;  %v4508_v13 = vld [vmem:[%s5359_s2 + $0x98] sm:$0xff]  }
 0x1e9   :  { %v3894_v18 = vpop.f32.mrf.mxu1 }
 0x1ea   :  { %v380_v20 = vmax.f32 %v320_v16, 0.0  ;;  %v415_v24 = vpack.c.bf16 %v382_v17, %v381_v21  ;;  %v341_v28 = vadd.f32 %v3894_v18, %v3277_v10 }
 0x1eb   :  { %v332_v22 = vpop.f32.mrf.mxu1 }
 0x1ec   :  { %v414_v23 = vpack.c.bf16 %v380_v20, %v379_v19  ;;  %v333_v26 = vadd.f32 %v3277_v10, %v332_v22  ;;  %v385_v36 = vmax.f32 %v341_v28, 0.0 }
 0x1ed   :  { %v3895_v25 = vpop.f32.mrf.mxu1 }
 0x1ee   :  { %v344_v27 = vadd.f32 %v3895_v25, %v3277_v10  ;;  %3920 = vmatprep.mubr.bf16.mxu0 %v414_v23  ;;  %v383_v34 = vmax.f32 %v333_v26, 0.0 }
 0x1ef   :  { %v335_v29 = vpop.f32.mrf.mxu1  ;;  %3921 = vmatmul.mubr.bf16.vlgmr.msra.gmra.mxu0 %v415_v24 }
 0x1f0   :  { %v336_v30 = vadd.f32 %v3277_v10, %v335_v29  ;;  %v386_v31 = vmax.f32 %v344_v27, 0.0  ;;  %3969 = vmatpush3.bf16.msra.mxu0 %v4504_v9 }
 0x1f1   :  { %v3898_v33 = vpop.f32.mrf.mxu1  ;;  %3970 = vmatprep.subr.bf16.mxu0 %v4505_v11 }
 0x1f2   :  { %v384_v35 = vmax.f32 %v336_v30, 0.0  ;;  %v417_v39 = vpack.c.bf16 %v386_v31, %v385_v36  ;;  %v357_v43 = vadd.f32 %v3898_v33, %v3277_v10 }
 0x1f3   :  { %v348_v37 = vpop.f32.mrf.mxu1 }
 0x1f4   :  { %v416_v38 = vpack.c.bf16 %v384_v35, %v383_v34  ;;  %v349_v41 = vadd.f32 %v3277_v10, %v348_v37  ;;  %v389_v50 = vmax.f32 %v357_v43, 0.0  ;;  %3971 = vmatpush3.bf16.msra.mxu0 %v4505_v11 }
 0x1f5   :  { %v3899_v40 = vpop.f32.mrf.mxu1 }
 0x1f6   :  { %v360_v42 = vadd.f32 %v3899_v40, %v3277_v10  ;;  %3924 = vmatprep.mubr.bf16.mxu0 %v416_v38  ;;  %v387_v48 = vmax.f32 %v349_v41, 0.0  ;;  %v4510_v40 = vld [vmem:[%s5359_s2 + $0x88] sm:$0xff]   ;;  %v4511_v41 = vld [vmem:[%s5359_s2 + $0x80] sm:$0xff]  }
 0x1f7   :  { %v351_v44 = vpop.f32.mrf.mxu1  ;;  %3925 = vmatmul.mubr.bf16.gmra.mxu0 %v417_v39  ;;  %v4509_v39 = vld [vmem:[%s5359_s2 + $0x90] sm:$0xff]  }
 0x1f8   :  { %v352_v45 = vadd.f32 %v3277_v10, %v351_v44  ;;  %v390_v46 = vmax.f32 %v360_v42, 0.0  ;;  %v3311_v44 = vld [vmem:[%s5362_s3 + $0x1] ss:$0 sm:$0xff] }
 0x1f9   :  { %v3902_v47 = vpop.f32.mrf.mxu1 }
 0x1fa   :  { %v388_v49 = vmax.f32 %v352_v45, 0.0  ;;  %v419_v53 = vpack.c.bf16 %v390_v46, %v389_v50  ;;  %v373_v57 = vadd.f32 %v3902_v47, %v3277_v10 }
 0x1fb   :  { %v364_v51 = vpop.f32.mrf.mxu1 }
 0x1fc   :  { %v418_v52 = vpack.c.bf16 %v388_v49, %v387_v48  ;;  %v365_v55 = vadd.f32 %v3277_v10, %v364_v51  ;;  %v393_v6 = vmax.f32 %v373_v57, 0.0 }
 0x1fd   :  { %v3903_v54 = vpop.f32.mrf.mxu1 }
 0x1fe   :  { %v376_v56 = vadd.f32 %v3903_v54, %v3277_v10  ;;  %3928 = vmatprep.mubr.bf16.mxu0 %v418_v52  ;;  %v391_v61 = vmax.f32 %v365_v55, 0.0 }
 0x1ff   :  { %v367_v58 = vpop.f32.mrf.mxu1  ;;  %3929 = vmatmul.mubr.bf16.gmra.mxu0 %v419_v53 }
 0x200   :  { %v368_v59 = vadd.f32 %v3277_v10, %v367_v58  ;;  %v394_v60 = vmax.f32 %v376_v56, 0.0  ;;  %v4506_v10 = vld [vmem:[%s5359_s2 + $0xa8] sm:$0xff]  }
 0x201   :  { %3972 = vmatprep.subr.bf16.mxu0 %v4506_v10 }
 0x202   :  { %v392_v5 = vmax.f32 %v368_v59, 0.0  ;;  %v421_v8 = vpack.c.bf16 %v394_v60, %v393_v6  ;;  %3973 = vmatpush3.bf16.msra.mxu0 %v4506_v10 }
 0x203   :  { %3974 = vmatprep.subr.bf16.mxu0 %v4507_v12 }
 0x204   :  { %v420_v7 = vpack.c.bf16 %v392_v5, %v391_v61 }
 0x206   :  { %3932 = vmatprep.mubr.bf16.mxu0 %v420_v7  ;;  %3975 = vmatpush3.bf16.msra.mxu0 %v4507_v12 }
 0x207   :  { %3933 = vmatmul.mubr.bf16.gmra.mxu0 %v421_v8  ;;  %3976 = vmatprep.subr.bf16.mxu0 %v4508_v13 }
 0x20a   :  { %3977 = vmatpush3.bf16.msra.mxu0 %v4508_v13 }
 0x20b   :  { %3978 = vmatprep.subr.bf16.mxu0 %v4509_v39 }
 0x20e   :  { %3979 = vmatpush3.bf16.msra.mxu0 %v4509_v39 }
 0x20f   :  { %3980 = vmatprep.subr.bf16.mxu0 %v4510_v40 }
 0x212   :  { %3981 = vmatpush3.bf16.msra.mxu0 %v4510_v40 }
 0x213   :  { %3982 = vmatprep.subr.bf16.mxu0 %v4511_v41 }
 0x216   :  { %3983 = vmatpush3.bf16.msra.mxu0 %v4511_v41 }
 0x2af   :  { %v3922_v14 = vpop.f32.mrf.mxu0 }
 0x2b1   :  { %v504_v15 = vpop.f32.mrf.mxu0 }
 0x2b3   :  { %v3923_v16 = vpop.f32.mrf.mxu0 }
 0x2b4   :  { %v568_v37 = vpack.c.bf16 %v3923_v16, %v3922_v14 }
 0x2b5   :  { %v507_v17 = vpop.f32.mrf.mxu0 }
 0x2b6   :  { %v567_v38 = vpack.c.bf16 %v507_v17, %v504_v15 }
 0x2b7   :  { %v3926_v18 = vpop.f32.mrf.mxu0 }
 0x2b9   :  { %v520_v19 = vpop.f32.mrf.mxu0 }
 0x2bb   :  { %v3927_v20 = vpop.f32.mrf.mxu0 }
 0x2bc   :  { %v570_v35 = vpack.c.bf16 %v3927_v20, %v3926_v18 }
 0x2bd   :  { %v523_v21 = vpop.f32.mrf.mxu0 }
 0x2be   :  { %v569_v36 = vpack.c.bf16 %v523_v21, %v520_v19 }
 0x2bf   :  { %v3930_v22 = vpop.f32.mrf.mxu0 }
 0x2c1   :  { %v536_v23 = vpop.f32.mrf.mxu0 }
 0x2c3   :  { %v3931_v24 = vpop.f32.mrf.mxu0 }
 0x2c4   :  { %v572_v33 = vpack.c.bf16 %v3931_v24, %v3930_v22 }
 0x2c5   :  { %v539_v25 = vpop.f32.mrf.mxu0 }
 0x2c6   :  { %v571_v34 = vpack.c.bf16 %v539_v25, %v536_v23 }
 0x2c7   :  { %v3934_v26 = vpop.f32.mrf.mxu0 }
 0x2c9   :  { %v552_v27 = vpop.f32.mrf.mxu0 }
 0x2cb   :  { %v3935_v28 = vpop.f32.mrf.mxu0 }
 0x2cc   :  { %v574_v29 = vpack.c.bf16 %v3935_v28, %v3934_v26 }
 0x2cd   :  { %v555_v30 = vpop.f32.mrf.mxu0 }
 0x2ce   :  { %v573_v31 = vpack.c.bf16 %v555_v30, %v552_v27  ;;  %3936 = vmatprep.subr.bf16.mxu1 %v574_v29 }
 0x2cf   :  { %3937 = vmatpush3.bf16.msra.mxu1 %v574_v29 }
 0x2d0   :  { %3938 = vmatprep.subr.bf16.mxu1 %v573_v31 }
 0x2d3   :  { %3939 = vmatpush3.bf16.msra.mxu1 %v573_v31 }
 0x2d4   :  { %3940 = vmatprep.subr.bf16.mxu1 %v572_v33 }
 0x2d7   :  { %3941 = vmatpush3.bf16.msra.mxu1 %v572_v33 }
 0x2d8   :  { %3942 = vmatprep.subr.bf16.mxu1 %v571_v34 }
 0x2db   :  { %3943 = vmatpush3.bf16.msra.mxu1 %v571_v34 }
 0x2dc   :  { %3944 = vmatprep.subr.bf16.mxu1 %v570_v35 }
 0x2df   :  { %3945 = vmatpush3.bf16.msra.mxu1 %v570_v35 }
 0x2e0   :  { %3946 = vmatprep.subr.bf16.mxu1 %v569_v36 }
 0x2e3   :  { %3947 = vmatpush3.bf16.msra.mxu1 %v569_v36 }
 0x2e4   :  { %3948 = vmatprep.subr.bf16.mxu1 %v568_v37 }
 0x2e7   :  { %3949 = vmatpush3.bf16.msra.mxu1 %v568_v37 }
 0x2e8   :  { %3950 = vmatprep.subr.bf16.mxu1 %v567_v38 }
 0x2eb   :  { %3951 = vmatpush3.bf16.msra.mxu1 %v567_v38 }
 0x2ee   :  { %3953 = vmatmul.mubr.bf16.vlgmr.msra.gmra.mxu1 %v4769_v62 }
 0x2ef   :  { %3956 = vmatprep.mubr.bf16.mxu1 %v4774_v63 }
 0x2f6   :  { %3957 = vmatmul.mubr.bf16.gmra.mxu1 %v4781_v0 }
 0x2f7   :  { %3960 = vmatprep.mubr.bf16.mxu1 %v4786_v1 }
 0x2fe   :  { %3961 = vmatmul.mubr.bf16.gmra.mxu1 %v4793_v2 }
 0x2ff   :  { %3964 = vmatprep.mubr.bf16.mxu1 %v4798_v3 }
 0x306   :  { %3965 = vmatmul.mubr.bf16.gmra.mxu1 %v4805_v4 }
 0x307   :  { %4016 = vmatprep.mubr.bf16.mxu1 %v4748_v32 }
 0x3ae   :  { %v3954_v42 = vpop.f32.mrf.mxu1 }
 0x3af   :  { %v624_v48 = vadd.f32 %v3954_v42, %v3311_v44 }
 0x3b0   :  { %v615_v43 = vpop.f32.mrf.mxu1 }
 0x3b1   :  { %v616_v46 = vadd.f32 %v3311_v44, %v615_v43  ;;  %v680_v55 = vmax.f32 %v624_v48, 0.0  ;;  %v4512_v43 = vld [vmem:[%s5359_s2 + $0xf8] sm:$0xff]  }
 0x3b2   :  { %v3955_v45 = vpop.f32.mrf.mxu1  ;;  %4032 = vmatprep.subr.bf16.mxu0 %v4512_v43 }
 0x3b3   :  { %v627_v47 = vadd.f32 %v3955_v45, %v3311_v44  ;;  %v678_v53 = vmax.f32 %v616_v46, 0.0  ;;  %v4513_v45 = vld [vmem:[%s5359_s2 + $0xf0] sm:$0xff]   ;;  %v4515_v46 = vld [vmem:[%s5359_s2 + $0xe0] sm:$0xff]  }
 0x3b4   :  { %v618_v49 = vpop.f32.mrf.mxu1 }
 0x3b5   :  { %v619_v50 = vadd.f32 %v3311_v44, %v618_v49  ;;  %v681_v51 = vmax.f32 %v627_v47, 0.0  ;;  %v4516_v47 = vld [vmem:[%s5359_s2 + $0xd8] sm:$0xff]  }
 0x3b6   :  { %v3958_v52 = vpop.f32.mrf.mxu1 }
 0x3b7   :  { %v679_v54 = vmax.f32 %v619_v50, 0.0  ;;  %v714_v58 = vpack.c.bf16 %v681_v51, %v680_v55  ;;  %v640_v5 = vadd.f32 %v3958_v52, %v3311_v44 }
 0x3b8   :  { %v631_v56 = vpop.f32.mrf.mxu1 }
 0x3b9   :  { %v713_v57 = vpack.c.bf16 %v679_v54, %v678_v53  ;;  %v632_v60 = vadd.f32 %v3311_v44, %v631_v56  ;;  %v684_v12 = vmax.f32 %v640_v5, 0.0 }
 0x3ba   :  { %v3959_v59 = vpop.f32.mrf.mxu1 }
 0x3bb   :  { %v643_v61 = vadd.f32 %v3959_v59, %v3311_v44  ;;  %3984 = vmatprep.mubr.bf16.mxu0 %v713_v57  ;;  %v682_v11 = vmax.f32 %v632_v60, 0.0 }
 0x3bc   :  { %v634_v6 = vpop.f32.mrf.mxu1  ;;  %3985 = vmatmul.mubr.bf16.vlgmr.msra.gmra.mxu0 %v714_v58 }
 0x3bd   :  { %v635_v7 = vadd.f32 %v3311_v44, %v634_v6  ;;  %v685_v8 = vmax.f32 %v643_v61, 0.0  ;;  %4033 = vmatpush3.bf16.msra.mxu0 %v4512_v43 }
 0x3be   :  { %v3962_v9 = vpop.f32.mrf.mxu1  ;;  %4034 = vmatprep.subr.bf16.mxu0 %v4513_v45 }
 0x3bf   :  { %v683_v10 = vmax.f32 %v635_v7, 0.0  ;;  %v716_v15 = vpack.c.bf16 %v685_v8, %v684_v12  ;;  %v656_v19 = vadd.f32 %v3962_v9, %v3311_v44 }
 0x3c0   :  { %v647_v13 = vpop.f32.mrf.mxu1 }
 0x3c1   :  { %v715_v14 = vpack.c.bf16 %v683_v10, %v682_v11  ;;  %v648_v17 = vadd.f32 %v3311_v44, %v647_v13  ;;  %v688_v26 = vmax.f32 %v656_v19, 0.0  ;;  %4035 = vmatpush3.bf16.msra.mxu0 %v4513_v45 }
 0x3c2   :  { %v3963_v16 = vpop.f32.mrf.mxu1 }
 0x3c3   :  { %v659_v18 = vadd.f32 %v3963_v16, %v3311_v44  ;;  %3988 = vmatprep.mubr.bf16.mxu0 %v715_v14  ;;  %v686_v24 = vmax.f32 %v648_v17, 0.0  ;;  %v4518_v16 = vld [vmem:[%s5359_s2 + $0xc8] sm:$0xff]   ;;  %v4519_v17 = vld [vmem:[%s5359_s2 + $0xc0] sm:$0xff]  }
 0x3c4   :  { %v650_v20 = vpop.f32.mrf.mxu1  ;;  %3989 = vmatmul.mubr.bf16.gmra.mxu0 %v716_v15  ;;  %v4517_v15 = vld [vmem:[%s5359_s2 + $0xd0] sm:$0xff]  }
 0x3c5   :  { %v651_v21 = vadd.f32 %v3311_v44, %v650_v20  ;;  %v689_v22 = vmax.f32 %v659_v18, 0.0  ;;  %v3337_v20 = vld [vmem:[%s5362_s3 + $0x2] ss:$0 sm:$0xff] }
 0x3c6   :  { %v3966_v23 = vpop.f32.mrf.mxu1 }
 0x3c7   :  { %v687_v25 = vmax.f32 %v651_v21, 0.0  ;;  %v718_v29 = vpack.c.bf16 %v689_v22, %v688_v26  ;;  %v672_v34 = vadd.f32 %v3966_v23, %v3311_v44 }
 0x3c8   :  { %v663_v27 = vpop.f32.mrf.mxu1 }
 0x3c9   :  { %v717_v28 = vpack.c.bf16 %v687_v25, %v686_v24  ;;  %v664_v31 = vadd.f32 %v3311_v44, %v663_v27  ;;  %v692_v40 = vmax.f32 %v672_v34, 0.0 }
 0x3ca   :  { %v3967_v30 = vpop.f32.mrf.mxu1 }
 0x3cb   :  { %v675_v33 = vadd.f32 %v3967_v30, %v3311_v44  ;;  %3992 = vmatprep.mubr.bf16.mxu0 %v717_v28  ;;  %v690_v38 = vmax.f32 %v664_v31, 0.0 }
 0x3cc   :  { %v666_v35 = vpop.f32.mrf.mxu1  ;;  %3993 = vmatmul.mubr.bf16.gmra.mxu0 %v718_v29 }
 0x3cd   :  { %v667_v36 = vadd.f32 %v3311_v44, %v666_v35  ;;  %v693_v37 = vmax.f32 %v675_v33, 0.0  ;;  %v4514_v44 = vld [vmem:[%s5359_s2 + $0xe8] sm:$0xff]  }
 0x3ce   :  { %4036 = vmatprep.subr.bf16.mxu0 %v4514_v44 }
 0x3cf   :  { %v691_v39 = vmax.f32 %v667_v36, 0.0  ;;  %v720_v42 = vpack.c.bf16 %v693_v37, %v692_v40  ;;  %4037 = vmatpush3.bf16.msra.mxu0 %v4514_v44 }
 0x3d0   :  { %4038 = vmatprep.subr.bf16.mxu0 %v4515_v46 }
 0x3d1   :  { %v719_v41 = vpack.c.bf16 %v691_v39, %v690_v38 }
 0x3d3   :  { %3996 = vmatprep.mubr.bf16.mxu0 %v719_v41  ;;  %4039 = vmatpush3.bf16.msra.mxu0 %v4515_v46 }
 0x3d4   :  { %3997 = vmatmul.mubr.bf16.gmra.mxu0 %v720_v42  ;;  %4040 = vmatprep.subr.bf16.mxu0 %v4516_v47 }
 0x3d7   :  { %4041 = vmatpush3.bf16.msra.mxu0 %v4516_v47 }
 0x3d8   :  { %4042 = vmatprep.subr.bf16.mxu0 %v4517_v15 }
 0x3db   :  { %4043 = vmatpush3.bf16.msra.mxu0 %v4517_v15 }
 0x3dc   :  { %4044 = vmatprep.subr.bf16.mxu0 %v4518_v16 }
 0x3df   :  { %4045 = vmatpush3.bf16.msra.mxu0 %v4518_v16 }
 0x3e0   :  { %4046 = vmatprep.subr.bf16.mxu0 %v4519_v17 }
 0x3e3   :  { %4047 = vmatpush3.bf16.msra.mxu0 %v4519_v17 }
 0x47c   :  { %v3986_v48 = vpop.f32.mrf.mxu0 }
 0x47e   :  { %v803_v49 = vpop.f32.mrf.mxu0 }
 0x480   :  { %v3987_v50 = vpop.f32.mrf.mxu0 }
 0x481   :  { %v867_v13 = vpack.c.bf16 %v3987_v50, %v3986_v48 }
 0x482   :  { %v806_v51 = vpop.f32.mrf.mxu0 }
 0x483   :  { %v866_v14 = vpack.c.bf16 %v806_v51, %v803_v49 }
 0x484   :  { %v3990_v52 = vpop.f32.mrf.mxu0 }
 0x486   :  { %v819_v53 = vpop.f32.mrf.mxu0 }
 0x488   :  { %v3991_v54 = vpop.f32.mrf.mxu0 }
 0x489   :  { %v869_v10 = vpack.c.bf16 %v3991_v54, %v3990_v52 }
 0x48a   :  { %v822_v55 = vpop.f32.mrf.mxu0 }
 0x48b   :  { %v868_v12 = vpack.c.bf16 %v822_v55, %v819_v53 }
 0x48c   :  { %v3994_v56 = vpop.f32.mrf.mxu0 }
 0x48e   :  { %v835_v57 = vpop.f32.mrf.mxu0 }
 0x490   :  { %v3995_v58 = vpop.f32.mrf.mxu0 }
 0x491   :  { %v871_v9 = vpack.c.bf16 %v3995_v58, %v3994_v56 }
 0x492   :  { %v838_v59 = vpop.f32.mrf.mxu0 }
 0x493   :  { %v870_v11 = vpack.c.bf16 %v838_v59, %v835_v57 }
 0x494   :  { %v3998_v60 = vpop.f32.mrf.mxu0 }
 0x496   :  { %v851_v61 = vpop.f32.mrf.mxu0 }
 0x498   :  { %v3999_v5 = vpop.f32.mrf.mxu0 }
 0x499   :  { %v873_v6 = vpack.c.bf16 %v3999_v5, %v3998_v60 }
 0x49a   :  { %v854_v7 = vpop.f32.mrf.mxu0 }
 0x49b   :  { %v872_v8 = vpack.c.bf16 %v854_v7, %v851_v61  ;;  %4000 = vmatprep.subr.bf16.mxu1 %v873_v6 }
 0x49c   :  { %4001 = vmatpush3.bf16.msra.mxu1 %v873_v6 }
 0x49d   :  { %4002 = vmatprep.subr.bf16.mxu1 %v872_v8 }
 0x4a0   :  { %4003 = vmatpush3.bf16.msra.mxu1 %v872_v8 }
 0x4a1   :  { %4004 = vmatprep.subr.bf16.mxu1 %v871_v9 }
 0x4a4   :  { %4005 = vmatpush3.bf16.msra.mxu1 %v871_v9 }
 0x4a5   :  { %4006 = vmatprep.subr.bf16.mxu1 %v870_v11 }
 0x4a8   :  { %4007 = vmatpush3.bf16.msra.mxu1 %v870_v11 }
 0x4a9   :  { %4008 = vmatprep.subr.bf16.mxu1 %v869_v10 }
 0x4ac   :  { %4009 = vmatpush3.bf16.msra.mxu1 %v869_v10 }
 0x4ad   :  { %4010 = vmatprep.subr.bf16.mxu1 %v868_v12 }
 0x4b0   :  { %4011 = vmatpush3.bf16.msra.mxu1 %v868_v12 }
 0x4b1   :  { %4012 = vmatprep.subr.bf16.mxu1 %v867_v13 }
 0x4b4   :  { %4013 = vmatpush3.bf16.msra.mxu1 %v867_v13 }
 0x4b5   :  { %4014 = vmatprep.subr.bf16.mxu1 %v866_v14 }
 0x4b8   :  { %4015 = vmatpush3.bf16.msra.mxu1 %v866_v14 }
 0x4bb   :  { %4017 = vmatmul.mubr.bf16.vlgmr.msra.gmra.mxu1 %v4769_v62 }
 0x4bc   :  { %4020 = vmatprep.mubr.bf16.mxu1 %v4774_v63 }
 0x4c3   :  { %4021 = vmatmul.mubr.bf16.gmra.mxu1 %v4781_v0 }
 0x4c4   :  { %4024 = vmatprep.mubr.bf16.mxu1 %v4786_v1 }
 0x4cb   :  { %4025 = vmatmul.mubr.bf16.gmra.mxu1 %v4793_v2 }
 0x4cc   :  { %4028 = vmatprep.mubr.bf16.mxu1 %v4798_v3 }
 0x4d3   :  { %4029 = vmatmul.mubr.bf16.gmra.mxu1 %v4805_v4 }
 0x4d4   :  { %4080 = vmatprep.mubr.bf16.mxu1 %v4748_v32 }
 0x57b   :  { %v4018_v18 = vpop.f32.mrf.mxu1 }
 0x57c   :  { %v923_v24 = vadd.f32 %v4018_v18, %v3337_v20 }
 0x57d   :  { %v914_v19 = vpop.f32.mrf.mxu1 }
 0x57e   :  { %v915_v22 = vadd.f32 %v3337_v20, %v914_v19  ;;  %v979_v31 = vmax.f32 %v923_v24, 0.0  ;;  %v4520_v19 = vld [vmem:[%s5359_s2 + $0x138] sm:$0xff]  }
 0x57f   :  { %v4019_v21 = vpop.f32.mrf.mxu1  ;;  %4096 = vmatprep.subr.bf16.mxu0 %v4520_v19 }
 0x580   :  { %v926_v23 = vadd.f32 %v4019_v21, %v3337_v20  ;;  %v977_v29 = vmax.f32 %v915_v22, 0.0  ;;  %v4521_v21 = vld [vmem:[%s5359_s2 + $0x130] sm:$0xff]   ;;  %v4523_v22 = vld [vmem:[%s5359_s2 + $0x120] sm:$0xff]  }
 0x581   :  { %v917_v25 = vpop.f32.mrf.mxu1 }
 0x582   :  { %v918_v26 = vadd.f32 %v3337_v20, %v917_v25  ;;  %v980_v27 = vmax.f32 %v926_v23, 0.0  ;;  %v4524_v23 = vld [vmem:[%s5359_s2 + $0x118] sm:$0xff]  }
 0x583   :  { %v4022_v28 = vpop.f32.mrf.mxu1 }
 0x584   :  { %v978_v30 = vmax.f32 %v918_v26, 0.0  ;;  %v1013_v35 = vpack.c.bf16 %v980_v27, %v979_v31  ;;  %v939_v39 = vadd.f32 %v4022_v28, %v3337_v20 }
 0x585   :  { %v930_v33 = vpop.f32.mrf.mxu1 }
 0x586   :  { %v1012_v34 = vpack.c.bf16 %v978_v30, %v977_v29  ;;  %v931_v37 = vadd.f32 %v3337_v20, %v930_v33  ;;  %v983_v46 = vmax.f32 %v939_v39, 0.0 }
 0x587   :  { %v4023_v36 = vpop.f32.mrf.mxu1 }
 0x588   :  { %v942_v38 = vadd.f32 %v4023_v36, %v3337_v20  ;;  %4048 = vmatprep.mubr.bf16.mxu0 %v1012_v34  ;;  %v981_v45 = vmax.f32 %v931_v37, 0.0 }
 0x589   :  { %v933_v40 = vpop.f32.mrf.mxu1  ;;  %4049 = vmatmul.mubr.bf16.vlgmr.msra.gmra.mxu0 %v1013_v35 }
 0x58a   :  { %v934_v41 = vadd.f32 %v3337_v20, %v933_v40  ;;  %v984_v42 = vmax.f32 %v942_v38, 0.0  ;;  %4097 = vmatpush3.bf16.msra.mxu0 %v4520_v19 }
 0x58b   :  { %v4026_v43 = vpop.f32.mrf.mxu1  ;;  %4098 = vmatprep.subr.bf16.mxu0 %v4521_v21 }
 0x58c   :  { %v982_v44 = vmax.f32 %v934_v41, 0.0  ;;  %v1015_v49 = vpack.c.bf16 %v984_v42, %v983_v46  ;;  %v955_v53 = vadd.f32 %v4026_v43, %v3337_v20 }
 0x58d   :  { %v946_v47 = vpop.f32.mrf.mxu1 }
 0x58e   :  { %v1014_v48 = vpack.c.bf16 %v982_v44, %v981_v45  ;;  %v947_v51 = vadd.f32 %v3337_v20, %v946_v47  ;;  %v987_v60 = vmax.f32 %v955_v53, 0.0  ;;  %4099 = vmatpush3.bf16.msra.mxu0 %v4521_v21 }
 0x58f   :  { %v4027_v50 = vpop.f32.mrf.mxu1 }
 0x590   :  { %v958_v52 = vadd.f32 %v4027_v50, %v3337_v20  ;;  %4052 = vmatprep.mubr.bf16.mxu0 %v1014_v48  ;;  %v985_v58 = vmax.f32 %v947_v51, 0.0 }
 0x591   :  { %v949_v54 = vpop.f32.mrf.mxu1  ;;  %4053 = vmatmul.mubr.bf16.gmra.mxu0 %v1015_v49  ;;  %v4525_v49 = vld [vmem:[%s5359_s2 + $0x110] sm:$0xff]  }
 0x592   :  { %v950_v55 = vadd.f32 %v3337_v20, %v949_v54  ;;  %v988_v56 = vmax.f32 %v958_v52, 0.0 }
 0x593   :  { %v4030_v57 = vpop.f32.mrf.mxu1 }
 0x594   :  { %v986_v59 = vmax.f32 %v950_v55, 0.0  ;;  %v1017_v6 = vpack.c.bf16 %v988_v56, %v987_v60  ;;  %v971_v11 = vadd.f32 %v4030_v57, %v3337_v20 }
 0x595   :  { %v962_v61 = vpop.f32.mrf.mxu1 }
 0x596   :  { %v1016_v5 = vpack.c.bf16 %v986_v59, %v985_v58  ;;  %v963_v8 = vadd.f32 %v3337_v20, %v962_v61  ;;  %v991_v16 = vmax.f32 %v971_v11, 0.0 }
 0x597   :  { %v4031_v7 = vpop.f32.mrf.mxu1 }
 0x598   :  { %v974_v9 = vadd.f32 %v4031_v7, %v3337_v20  ;;  %4056 = vmatprep.mubr.bf16.mxu0 %v1016_v5  ;;  %v989_v14 = vmax.f32 %v963_v8, 0.0 }
 0x599   :  { %v965_v10 = vpop.f32.mrf.mxu1  ;;  %4057 = vmatmul.mubr.bf16.gmra.mxu0 %v1017_v6 }
 0x59a   :  { %v966_v12 = vadd.f32 %v3337_v20, %v965_v10  ;;  %v992_v13 = vmax.f32 %v974_v9, 0.0  ;;  %v4522_v20 = vld [vmem:[%s5359_s2 + $0x128] sm:$0xff]  }
 0x59b   :  { %4100 = vmatprep.subr.bf16.mxu0 %v4522_v20 }
 0x59c   :  { %v990_v15 = vmax.f32 %v966_v12, 0.0  ;;  %v1019_v18 = vpack.c.bf16 %v992_v13, %v991_v16  ;;  %4101 = vmatpush3.bf16.msra.mxu0 %v4522_v20 }
 0x59d   :  { %4102 = vmatprep.subr.bf16.mxu0 %v4523_v22 }
 0x59e   :  { %v1018_v17 = vpack.c.bf16 %v990_v15, %v989_v14 }
 0x5a0   :  { %4060 = vmatprep.mubr.bf16.mxu0 %v1018_v17  ;;  %4103 = vmatpush3.bf16.msra.mxu0 %v4523_v22 }
 0x5a1   :  { %4061 = vmatmul.mubr.bf16.gmra.mxu0 %v1019_v18  ;;  %4104 = vmatprep.subr.bf16.mxu0 %v4524_v23 }
 0x5a4   :  { %4105 = vmatpush3.bf16.msra.mxu0 %v4524_v23 }
 0x5a5   :  { %4106 = vmatprep.subr.bf16.mxu0 %v4525_v49 }
 0x5a8   :  { %4107 = vmatpush3.bf16.msra.mxu0 %v4525_v49  ;;  %v4532_v49 = vld [vmem:[%s5359_s2 + $0x158] sm:$0xff]  }
 0x649   :  { %v4050_v24 = vpop.f32.mrf.mxu0 }
 0x64b   :  { %v1102_v25 = vpop.f32.mrf.mxu0 }
 0x64d   :  { %v4051_v26 = vpop.f32.mrf.mxu0 }
 0x64e   :  { %v1166_v47 = vpack.c.bf16 %v4051_v26, %v4050_v24 }
 0x64f   :  { %v1105_v27 = vpop.f32.mrf.mxu0 }
 0x650   :  { %v1165_v48 = vpack.c.bf16 %v1105_v27, %v1102_v25 }
 0x651   :  { %v4054_v28 = vpop.f32.mrf.mxu0 }
 0x653   :  { %v1118_v29 = vpop.f32.mrf.mxu0 }
 0x655   :  { %v4055_v30 = vpop.f32.mrf.mxu0 }
 0x656   :  { %v1168_v44 = vpack.c.bf16 %v4055_v30, %v4054_v28 }
 0x657   :  { %v1121_v31 = vpop.f32.mrf.mxu0 }
 0x658   :  { %v1167_v46 = vpack.c.bf16 %v1121_v31, %v1118_v29 }
 0x659   :  { %v4058_v33 = vpop.f32.mrf.mxu0 }
 0x65b   :  { %v1134_v34 = vpop.f32.mrf.mxu0 }
 0x65d   :  { %v4059_v35 = vpop.f32.mrf.mxu0 }
 0x65e   :  { %v1170_v43 = vpack.c.bf16 %v4059_v35, %v4058_v33 }
 0x65f   :  { %v1137_v36 = vpop.f32.mrf.mxu0 }
 0x660   :  { %v1169_v45 = vpack.c.bf16 %v1137_v36, %v1134_v34 }
 0x661   :  { %v4062_v37 = vpop.f32.mrf.mxu0 }
 0x663   :  { %v1150_v38 = vpop.f32.mrf.mxu0 }
 0x665   :  { %v4063_v39 = vpop.f32.mrf.mxu0 }
 0x666   :  { %v1172_v40 = vpack.c.bf16 %v4063_v39, %v4062_v37 }
 0x667   :  { %v1153_v41 = vpop.f32.mrf.mxu0 }
 0x668   :  { %v1171_v42 = vpack.c.bf16 %v1153_v41, %v1150_v38  ;;  %4064 = vmatprep.subr.bf16.mxu1 %v1172_v40 }
 0x669   :  { %4065 = vmatpush3.bf16.msra.mxu1 %v1172_v40 }
 0x66a   :  { %4066 = vmatprep.subr.bf16.mxu1 %v1171_v42 }
 0x66d   :  { %4067 = vmatpush3.bf16.msra.mxu1 %v1171_v42 }
 0x66e   :  { %4068 = vmatprep.subr.bf16.mxu1 %v1170_v43 }
 0x671   :  { %4069 = vmatpush3.bf16.msra.mxu1 %v1170_v43 }
 0x672   :  { %4070 = vmatprep.subr.bf16.mxu1 %v1169_v45 }
 0x675   :  { %4071 = vmatpush3.bf16.msra.mxu1 %v1169_v45 }
 0x676   :  { %4072 = vmatprep.subr.bf16.mxu1 %v1168_v44 }
 0x679   :  { %4073 = vmatpush3.bf16.msra.mxu1 %v1168_v44  ;;  %v4528_v44 = vld [vmem:[%s5359_s2 + $0x178] sm:$0xff]  }
 0x67a   :  { %4074 = vmatprep.subr.bf16.mxu1 %v1167_v46 }
 0x67d   :  { %4075 = vmatpush3.bf16.msra.mxu1 %v1167_v46  ;;  %v4529_v46 = vld [vmem:[%s5359_s2 + $0x170] sm:$0xff]  }
 0x67e   :  { %4076 = vmatprep.subr.bf16.mxu1 %v1166_v47 }
 0x681   :  { %4077 = vmatpush3.bf16.msra.mxu1 %v1166_v47  ;;  %v4530_v47 = vld [vmem:[%s5359_s2 + $0x168] sm:$0xff]  }
 0x682   :  { %4078 = vmatprep.subr.bf16.mxu1 %v1165_v48 }
 0x685   :  { %4079 = vmatpush3.bf16.msra.mxu1 %v1165_v48  ;;  %v4531_v48 = vld [vmem:[%s5359_s2 + $0x160] sm:$0xff]  }
 0x688   :  { %4081 = vmatmul.mubr.bf16.vlgmr.msra.gmra.mxu1 %v4769_v62  ;;  %v4526_v62 = vld [vmem:[%s5359_s2 + $0x108] sm:$0xff]  }
 0x689   :  { %4084 = vmatprep.mubr.bf16.mxu1 %v4774_v63  ;;  %4108 = vmatprep.subr.bf16.mxu0 %v4526_v62  ;;  %v4527_v63 = vld [vmem:[%s5359_s2 + $0x100] sm:$0xff]  }
 0x68a   :  { %4109 = vmatpush3.bf16.msra.mxu0 %v4526_v62 }
 0x68b   :  { %4110 = vmatprep.subr.bf16.mxu0 %v4527_v63 }
 0x68e   :  { %4111 = vmatpush3.bf16.msra.mxu0 %v4527_v63 }
 0x68f   :  { %4160 = vmatprep.subr.bf16.mxu0 %v4528_v44 }
 0x690   :  { %4085 = vmatmul.mubr.bf16.gmra.mxu1 %v4781_v0 }
 0x691   :  { %4088 = vmatprep.mubr.bf16.mxu1 %v4786_v1  ;;  %v3363_v1 = vld [vmem:[%s5362_s3 + $0x3] ss:$0 sm:$0xff] }
 0x698   :  { %4089 = vmatmul.mubr.bf16.gmra.mxu1 %v4793_v2 }
 0x699   :  { %4092 = vmatprep.mubr.bf16.mxu1 %v4798_v3 }
 0x6a0   :  { %4093 = vmatmul.mubr.bf16.gmra.mxu1 %v4805_v4 }
 0x6a1   :  { %4144 = vmatprep.mubr.bf16.mxu1 %v4748_v32 }
 0x748   :  { %v4082_v0 = vpop.f32.mrf.mxu1 }
 0x749   :  { %v1222_v50 = vadd.f32 %v4082_v0, %v3363_v1 }
 0x74a   :  { %v1213_v32 = vpop.f32.mrf.mxu1 }
 0x74b   :  { %v1214_v3 = vadd.f32 %v3363_v1, %v1213_v32  ;;  %v1278_v57 = vmax.f32 %v1222_v50, 0.0 }
 0x74c   :  { %v4083_v2 = vpop.f32.mrf.mxu1 }
 0x74d   :  { %v1225_v4 = vadd.f32 %v4083_v2, %v3363_v1  ;;  %v1276_v55 = vmax.f32 %v1214_v3, 0.0 }
 0x74e   :  { %v1216_v51 = vpop.f32.mrf.mxu1 }
 0x74f   :  { %v1217_v52 = vadd.f32 %v3363_v1, %v1216_v51  ;;  %v1279_v53 = vmax.f32 %v1225_v4, 0.0 }
 0x750   :  { %v4086_v54 = vpop.f32.mrf.mxu1 }
 0x751   :  { %v1277_v56 = vmax.f32 %v1217_v52, 0.0  ;;  %v1312_v60 = vpack.c.bf16 %v1279_v53, %v1278_v57  ;;  %v1238_v7 = vadd.f32 %v4086_v54, %v3363_v1 }
 0x752   :  { %v1229_v58 = vpop.f32.mrf.mxu1 }
 0x753   :  { %v1311_v59 = vpack.c.bf16 %v1277_v56, %v1276_v55  ;;  %v1230_v5 = vadd.f32 %v3363_v1, %v1229_v58  ;;  %v1282_v14 = vmax.f32 %v1238_v7, 0.0 }
 0x754   :  { %v4087_v61 = vpop.f32.mrf.mxu1 }
 0x755   :  { %v1241_v6 = vadd.f32 %v4087_v61, %v3363_v1  ;;  %4112 = vmatprep.mubr.bf16.mxu0 %v1311_v59  ;;  %v1280_v12 = vmax.f32 %v1230_v5, 0.0 }
 0x756   :  { %v1232_v8 = vpop.f32.mrf.mxu1  ;;  %4113 = vmatmul.mubr.bf16.vlgmr.msra.gmra.mxu0 %v1312_v60 }
 0x757   :  { %v1233_v9 = vadd.f32 %v3363_v1, %v1232_v8  ;;  %v1283_v11 = vmax.f32 %v1241_v6, 0.0  ;;  %4161 = vmatpush3.bf16.msra.mxu0 %v4528_v44 }
 0x758   :  { %v4090_v10 = vpop.f32.mrf.mxu1  ;;  %4162 = vmatprep.subr.bf16.mxu0 %v4529_v46 }
 0x759   :  { %v1281_v13 = vmax.f32 %v1233_v9, 0.0  ;;  %v1314_v17 = vpack.c.bf16 %v1283_v11, %v1282_v14  ;;  %v1254_v20 = vadd.f32 %v4090_v10, %v3363_v1  ;;  %v4944_v9 = vld [vmem:[%s5361_s1 + $0x8] sm:$0xff]   ;;  %v4950_v11 = vld [vmem:[%s5361_s1 + $0x10] sm:$0xff]   ;;  %v4956_v10 = vld [vmem:[%s5361_s1 + $0x18] sm:$0xff]  }
 0x75a   :  { %v1245_v15 = vpop.f32.mrf.mxu1  ;;  %v4974_v14 = vld [vmem:[%s5361_s1 + $0x30] sm:$0xff]  }
 0x75b   :  { %v1313_v16 = vpack.c.bf16 %v1281_v13, %v1280_v12  ;;  %v1246_v19 = vadd.f32 %v3363_v1, %v1245_v15  ;;  %v1286_v28 = vmax.f32 %v1254_v20, 0.0  ;;  %4163 = vmatpush3.bf16.msra.mxu0 %v4529_v46  ;;  %v4962_v12 = vld [vmem:[%s5361_s1 + $0x20] sm:$0xff]   ;;  %v4968_v13 = vld [vmem:[%s5361_s1 + $0x28] sm:$0xff]   ;;  %v4980_v15 = vld [vmem:[%s5361_s1 + $0x38] sm:$0xff]  }
 0x75c   :  { %v4091_v18 = vpop.f32.mrf.mxu1  ;;  %4164 = vmatprep.subr.bf16.mxu0 %v4530_v47 }
 0x75d   :  { %v1257_v21 = vadd.f32 %v4091_v18, %v3363_v1  ;;  %4116 = vmatprep.mubr.bf16.mxu0 %v1313_v16  ;;  %v1284_v26 = vmax.f32 %v1246_v19, 0.0  ;;  %v4986_v16 = vld [vmem:[%s5361_s1] sm:$0xff]   ;;  %v4534_v18 = vld [vmem:[%s5359_s2 + $0x148] sm:$0xff]  }
 0x75e   :  { %v1248_v22 = vpop.f32.mrf.mxu1  ;;  %4117 = vmatmul.mubr.bf16.gmra.mxu0 %v1314_v17  ;;  %v4533_v17 = vld [vmem:[%s5359_s2 + $0x150] sm:$0xff]   ;;  %v4535_v19 = vld [vmem:[%s5359_s2 + $0x140] sm:$0xff]  }
 0x75f   :  { %v1249_v23 = vadd.f32 %v3363_v1, %v1248_v22  ;;  %v1287_v24 = vmax.f32 %v1257_v21, 0.0  ;;  %4165 = vmatpush3.bf16.msra.mxu0 %v4530_v47  ;;  %v3389_v22 = vld [vmem:[%s5362_s3 + $0x4] ss:$0 sm:$0xff] }
 0x760   :  { %v4094_v25 = vpop.f32.mrf.mxu1  ;;  %4166 = vmatprep.subr.bf16.mxu0 %v4531_v48 }
 0x761   :  { %v1285_v27 = vmax.f32 %v1249_v23, 0.0  ;;  %v1316_v31 = vpack.c.bf16 %v1287_v24, %v1286_v28  ;;  %v1270_v36 = vadd.f32 %v4094_v25, %v3363_v1 }
 0x762   :  { %v1261_v29 = vpop.f32.mrf.mxu1 }
 0x763   :  { %v1315_v30 = vpack.c.bf16 %v1285_v27, %v1284_v26  ;;  %v1262_v34 = vadd.f32 %v3363_v1, %v1261_v29  ;;  %v1290_v42 = vmax.f32 %v1270_v36, 0.0  ;;  %4167 = vmatpush3.bf16.msra.mxu0 %v4531_v48 }
 0x764   :  { %v4095_v33 = vpop.f32.mrf.mxu1  ;;  %4168 = vmatprep.subr.bf16.mxu0 %v4532_v49 }
 0x765   :  { %v1273_v35 = vadd.f32 %v4095_v33, %v3363_v1  ;;  %4120 = vmatprep.mubr.bf16.mxu0 %v1315_v30  ;;  %v1288_v40 = vmax.f32 %v1262_v34, 0.0 }
 0x766   :  { %v1264_v37 = vpop.f32.mrf.mxu1  ;;  %4121 = vmatmul.mubr.bf16.gmra.mxu0 %v1316_v31 }
 0x767   :  { %v1265_v38 = vadd.f32 %v3363_v1, %v1264_v37  ;;  %v1291_v39 = vmax.f32 %v1273_v35, 0.0  ;;  %4169 = vmatpush3.bf16.msra.mxu0 %v4532_v49 }
 0x768   :  { %4170 = vmatprep.subr.bf16.mxu0 %v4533_v17 }
 0x769   :  { %v1289_v41 = vmax.f32 %v1265_v38, 0.0  ;;  %v1318_v45 = vpack.c.bf16 %v1291_v39, %v1290_v42 }
 0x76b   :  { %v1317_v43 = vpack.c.bf16 %v1289_v41, %v1288_v40  ;;  %4171 = vmatpush3.bf16.msra.mxu0 %v4533_v17 }
 0x76c   :  { %4172 = vmatprep.subr.bf16.mxu0 %v4534_v18 }
 0x76d   :  { %4124 = vmatprep.mubr.bf16.mxu0 %v1317_v43 }
 0x76e   :  { %4125 = vmatmul.mubr.bf16.gmra.mxu0 %v1318_v45 }
 0x76f   :  { %4173 = vmatpush3.bf16.msra.mxu0 %v4534_v18 }
 0x770   :  { %4174 = vmatprep.subr.bf16.mxu0 %v4535_v19 }
 0x773   :  { %4175 = vmatpush3.bf16.msra.mxu0 %v4535_v19 }
 0x816   :  { %v4114_v62 = vpop.f32.mrf.mxu0 }
 0x818   :  { %v1401_v63 = vpop.f32.mrf.mxu0 }
 0x81a   :  { %v4115_v0 = vpop.f32.mrf.mxu0 }
 0x81b   :  { %v1465_v7 = vpack.c.bf16 %v4115_v0, %v4114_v62 }
 0x81c   :  { %v1404_v32 = vpop.f32.mrf.mxu0 }
 0x81d   :  { %v1464_v8 = vpack.c.bf16 %v1404_v32, %v1401_v63 }
 0x81e   :  { %v4118_v1 = vpop.f32.mrf.mxu0 }
 0x820   :  { %v1417_v2 = vpop.f32.mrf.mxu0 }
 0x822   :  { %v4119_v3 = vpop.f32.mrf.mxu0 }
 0x823   :  { %v1467_v5 = vpack.c.bf16 %v4119_v3, %v4118_v1 }
 0x824   :  { %v1420_v4 = vpop.f32.mrf.mxu0 }
 0x825   :  { %v1466_v6 = vpack.c.bf16 %v1420_v4, %v1417_v2 }
 0x826   :  { %v4122_v50 = vpop.f32.mrf.mxu0 }
 0x828   :  { %v1433_v51 = vpop.f32.mrf.mxu0 }
 0x82a   :  { %v4123_v52 = vpop.f32.mrf.mxu0 }
 0x82b   :  { %v1469_v60 = vpack.c.bf16 %v4123_v52, %v4122_v50 }
 0x82c   :  { %v1436_v53 = vpop.f32.mrf.mxu0 }
 0x82d   :  { %v1468_v61 = vpack.c.bf16 %v1436_v53, %v1433_v51 }
 0x82e   :  { %v4126_v54 = vpop.f32.mrf.mxu0 }
 0x830   :  { %v1449_v55 = vpop.f32.mrf.mxu0 }
 0x832   :  { %v4127_v56 = vpop.f32.mrf.mxu0 }
 0x833   :  { %v1471_v57 = vpack.c.bf16 %v4127_v56, %v4126_v54 }
 0x834   :  { %v1452_v58 = vpop.f32.mrf.mxu0 }
 0x835   :  { %v1470_v59 = vpack.c.bf16 %v1452_v58, %v1449_v55  ;;  %4128 = vmatprep.subr.bf16.mxu1 %v1471_v57 }
 0x836   :  { %4129 = vmatpush3.bf16.msra.mxu1 %v1471_v57 }
 0x837   :  { %4130 = vmatprep.subr.bf16.mxu1 %v1470_v59 }
 0x83a   :  { %4131 = vmatpush3.bf16.msra.mxu1 %v1470_v59 }
 0x83b   :  { %4132 = vmatprep.subr.bf16.mxu1 %v1469_v60 }
 0x83e   :  { %4133 = vmatpush3.bf16.msra.mxu1 %v1469_v60 }
 0x83f   :  { %4134 = vmatprep.subr.bf16.mxu1 %v1468_v61 }
 0x842   :  { %4135 = vmatpush3.bf16.msra.mxu1 %v1468_v61 }
 0x843   :  { %4136 = vmatprep.subr.bf16.mxu1 %v1467_v5 }
 0x846   :  { %4137 = vmatpush3.bf16.msra.mxu1 %v1467_v5 }
 0x847   :  { %4138 = vmatprep.subr.bf16.mxu1 %v1466_v6 }
 0x84a   :  { %4139 = vmatpush3.bf16.msra.mxu1 %v1466_v6 }
 0x84b   :  { %4140 = vmatprep.subr.bf16.mxu1 %v1465_v7 }
 0x84e   :  { %4141 = vmatpush3.bf16.msra.mxu1 %v1465_v7 }
 0x84f   :  { %4142 = vmatprep.subr.bf16.mxu1 %v1464_v8 }
 0x852   :  { %4143 = vmatpush3.bf16.msra.mxu1 %v1464_v8 }
 0x855   :  { %4145 = vmatmul.mubr.bf16.vlgmr.msra.gmra.mxu1 %v4944_v9 }
 0x856   :  { %4148 = vmatprep.mubr.bf16.mxu1 %v4950_v11 }
 0x85d   :  { %4149 = vmatmul.mubr.bf16.gmra.mxu1 %v4956_v10 }
 0x85e   :  { %4152 = vmatprep.mubr.bf16.mxu1 %v4962_v12 }
 0x865   :  { %4153 = vmatmul.mubr.bf16.gmra.mxu1 %v4968_v13 }
 0x866   :  { %4156 = vmatprep.mubr.bf16.mxu1 %v4974_v14 }
 0x86d   :  { %4157 = vmatmul.mubr.bf16.gmra.mxu1 %v4980_v15 }
 0x86e   :  { %4208 = vmatprep.mubr.bf16.mxu1 %v4986_v16 }
 0x915   :  { %v4146_v21 = vpop.f32.mrf.mxu1 }
 0x916   :  { %v1521_v26 = vadd.f32 %v4146_v21, %v3389_v22 }
 0x917   :  { %v1512_v20 = vpop.f32.mrf.mxu1 }
 0x918   :  { %v1513_v24 = vadd.f32 %v3389_v22, %v1512_v20  ;;  %v1577_v34 = vmax.f32 %v1521_v26, 0.0  ;;  %v4536_v20 = vld [vmem:[%s5359_s2 + $0x1b8] sm:$0xff]  }
 0x919   :  { %v4147_v23 = vpop.f32.mrf.mxu1  ;;  %4224 = vmatprep.subr.bf16.mxu0 %v4536_v20 }
 0x91a   :  { %v1524_v25 = vadd.f32 %v4147_v23, %v3389_v22  ;;  %v1575_v31 = vmax.f32 %v1513_v24, 0.0  ;;  %v4537_v23 = vld [vmem:[%s5359_s2 + $0x1b0] sm:$0xff]   ;;  %v4539_v24 = vld [vmem:[%s5359_s2 + $0x1a0] sm:$0xff]  }
 0x91b   :  { %v1515_v27 = vpop.f32.mrf.mxu1 }
 0x91c   :  { %v1516_v28 = vadd.f32 %v3389_v22, %v1515_v27  ;;  %v1578_v29 = vmax.f32 %v1524_v25, 0.0  ;;  %v4540_v25 = vld [vmem:[%s5359_s2 + $0x198] sm:$0xff]  }
 0x91d   :  { %v4150_v30 = vpop.f32.mrf.mxu1 }
 0x91e   :  { %v1576_v33 = vmax.f32 %v1516_v28, 0.0  ;;  %v1611_v37 = vpack.c.bf16 %v1578_v29, %v1577_v34  ;;  %v1537_v41 = vadd.f32 %v4150_v30, %v3389_v22 }
 0x91f   :  { %v1528_v35 = vpop.f32.mrf.mxu1 }
 0x920   :  { %v1610_v36 = vpack.c.bf16 %v1576_v33, %v1575_v31  ;;  %v1529_v39 = vadd.f32 %v3389_v22, %v1528_v35  ;;  %v1581_v48 = vmax.f32 %v1537_v41, 0.0 }
 0x921   :  { %v4151_v38 = vpop.f32.mrf.mxu1 }
 0x922   :  { %v1540_v40 = vadd.f32 %v4151_v38, %v3389_v22  ;;  %4176 = vmatprep.mubr.bf16.mxu0 %v1610_v36  ;;  %v1579_v46 = vmax.f32 %v1529_v39, 0.0 }
 0x923   :  { %v1531_v42 = vpop.f32.mrf.mxu1  ;;  %4177 = vmatmul.mubr.bf16.vlgmr.msra.gmra.mxu0 %v1611_v37 }
 0x924   :  { %v1532_v43 = vadd.f32 %v3389_v22, %v1531_v42  ;;  %v1582_v45 = vmax.f32 %v1540_v40, 0.0  ;;  %4225 = vmatpush3.bf16.msra.mxu0 %v4536_v20 }
 0x925   :  { %v4154_v44 = vpop.f32.mrf.mxu1  ;;  %4226 = vmatprep.subr.bf16.mxu0 %v4537_v23 }
 0x926   :  { %v1580_v47 = vmax.f32 %v1532_v43, 0.0  ;;  %v1613_v63 = vpack.c.bf16 %v1582_v45, %v1581_v48  ;;  %v1553_v2 = vadd.f32 %v4154_v44, %v3389_v22 }
 0x927   :  { %v1544_v49 = vpop.f32.mrf.mxu1 }
 0x928   :  { %v1612_v62 = vpack.c.bf16 %v1580_v47, %v1579_v46  ;;  %v1545_v32 = vadd.f32 %v3389_v22, %v1544_v49  ;;  %v1585_v54 = vmax.f32 %v1553_v2, 0.0  ;;  %4227 = vmatpush3.bf16.msra.mxu0 %v4537_v23 }
 0x929   :  { %v4155_v0 = vpop.f32.mrf.mxu1 }
 0x92a   :  { %v1556_v1 = vadd.f32 %v4155_v0, %v3389_v22  ;;  %4180 = vmatprep.mubr.bf16.mxu0 %v1612_v62  ;;  %v1583_v52 = vmax.f32 %v1545_v32, 0.0  ;;  %v4542_v0 = vld [vmem:[%s5359_s2 + $0x188] sm:$0xff]   ;;  %v4543_v32 = vld [vmem:[%s5359_s2 + $0x180] sm:$0xff]  }
 0x92b   :  { %v1547_v3 = vpop.f32.mrf.mxu1  ;;  %4181 = vmatmul.mubr.bf16.gmra.mxu0 %v1613_v63  ;;  %v4541_v63 = vld [vmem:[%s5359_s2 + $0x190] sm:$0xff]  }
 0x92c   :  { %v1548_v4 = vadd.f32 %v3389_v22, %v1547_v3  ;;  %v1586_v50 = vmax.f32 %v1556_v1, 0.0  ;;  %v3415_v3 = vld [vmem:[%s5362_s3 + $0x5] ss:$0 sm:$0xff] }
 0x92d   :  { %v4158_v51 = vpop.f32.mrf.mxu1 }
 0x92e   :  { %v1584_v53 = vmax.f32 %v1548_v4, 0.0  ;;  %v1615_v57 = vpack.c.bf16 %v1586_v50, %v1585_v54  ;;  %v1569_v61 = vadd.f32 %v4158_v51, %v3389_v22 }
 0x92f   :  { %v1560_v55 = vpop.f32.mrf.mxu1 }
 0x930   :  { %v1614_v56 = vpack.c.bf16 %v1584_v53, %v1583_v52  ;;  %v1561_v59 = vadd.f32 %v3389_v22, %v1560_v55  ;;  %v1589_v18 = vmax.f32 %v1569_v61, 0.0 }
 0x931   :  { %v4159_v58 = vpop.f32.mrf.mxu1 }
 0x932   :  { %v1572_v60 = vadd.f32 %v4159_v58, %v3389_v22  ;;  %4184 = vmatprep.mubr.bf16.mxu0 %v1614_v56  ;;  %v1587_v8 = vmax.f32 %v1561_v59, 0.0 }
 0x933   :  { %v1563_v5 = vpop.f32.mrf.mxu1  ;;  %4185 = vmatmul.mubr.bf16.gmra.mxu0 %v1615_v57 }
 0x934   :  { %v1564_v6 = vadd.f32 %v3389_v22, %v1563_v5  ;;  %v1590_v7 = vmax.f32 %v1572_v60, 0.0  ;;  %v4538_v22 = vld [vmem:[%s5359_s2 + $0x1a8] sm:$0xff]  }
 0x935   :  { %4228 = vmatprep.subr.bf16.mxu0 %v4538_v22 }
 0x936   :  { %v1588_v17 = vmax.f32 %v1564_v6, 0.0  ;;  %v1617_v21 = vpack.c.bf16 %v1590_v7, %v1589_v18  ;;  %4229 = vmatpush3.bf16.msra.mxu0 %v4538_v22 }
 0x937   :  { %4230 = vmatprep.subr.bf16.mxu0 %v4539_v24 }
 0x938   :  { %v1616_v19 = vpack.c.bf16 %v1588_v17, %v1587_v8 }
 0x93a   :  { %4188 = vmatprep.mubr.bf16.mxu0 %v1616_v19  ;;  %4231 = vmatpush3.bf16.msra.mxu0 %v4539_v24 }
 0x93b   :  { %4189 = vmatmul.mubr.bf16.gmra.mxu0 %v1617_v21  ;;  %4232 = vmatprep.subr.bf16.mxu0 %v4540_v25 }
 0x93e   :  { %4233 = vmatpush3.bf16.msra.mxu0 %v4540_v25 }
 0x93f   :  { %4234 = vmatprep.subr.bf16.mxu0 %v4541_v63 }
 0x942   :  { %4235 = vmatpush3.bf16.msra.mxu0 %v4541_v63 }
 0x943   :  { %4236 = vmatprep.subr.bf16.mxu0 %v4542_v0 }
 0x946   :  { %4237 = vmatpush3.bf16.msra.mxu0 %v4542_v0 }
 0x947   :  { %4238 = vmatprep.subr.bf16.mxu0 %v4543_v32 }
 0x94a   :  { %4239 = vmatpush3.bf16.msra.mxu0 %v4543_v32 }
 0x9e3   :  { %v4178_v26 = vpop.f32.mrf.mxu0 }
 0x9e5   :  { %v1700_v27 = vpop.f32.mrf.mxu0 }
 0x9e7   :  { %v4179_v28 = vpop.f32.mrf.mxu0 }
 0x9e8   :  { %v1764_v49 = vpack.c.bf16 %v4179_v28, %v4178_v26 }
 0x9e9   :  { %v1703_v29 = vpop.f32.mrf.mxu0 }
 0x9ea   :  { %v1763_v62 = vpack.c.bf16 %v1703_v29, %v1700_v27 }
 0x9eb   :  { %v4182_v30 = vpop.f32.mrf.mxu0 }
 0x9ed   :  { %v1716_v31 = vpop.f32.mrf.mxu0 }
 0x9ef   :  { %v4183_v33 = vpop.f32.mrf.mxu0 }
 0x9f0   :  { %v1766_v47 = vpack.c.bf16 %v4183_v33, %v4182_v30 }
 0x9f1   :  { %v1719_v34 = vpop.f32.mrf.mxu0 }
 0x9f2   :  { %v1765_v48 = vpack.c.bf16 %v1719_v34, %v1716_v31 }
 0x9f3   :  { %v4186_v35 = vpop.f32.mrf.mxu0 }
 0x9f5   :  { %v1732_v36 = vpop.f32.mrf.mxu0 }
 0x9f7   :  { %v4187_v37 = vpop.f32.mrf.mxu0 }
 0x9f8   :  { %v1768_v44 = vpack.c.bf16 %v4187_v37, %v4186_v35 }
 0x9f9   :  { %v1735_v38 = vpop.f32.mrf.mxu0 }
 0x9fa   :  { %v1767_v46 = vpack.c.bf16 %v1735_v38, %v1732_v36 }
 0x9fb   :  { %v4190_v39 = vpop.f32.mrf.mxu0 }
 0x9fd   :  { %v1748_v40 = vpop.f32.mrf.mxu0 }
 0x9ff   :  { %v4191_v41 = vpop.f32.mrf.mxu0 }
 0xa00   :  { %v1770_v42 = vpack.c.bf16 %v4191_v41, %v4190_v39 }
 0xa01   :  { %v1751_v43 = vpop.f32.mrf.mxu0 }
 0xa02   :  { %v1769_v45 = vpack.c.bf16 %v1751_v43, %v1748_v40  ;;  %4192 = vmatprep.subr.bf16.mxu1 %v1770_v42 }
 0xa03   :  { %4193 = vmatpush3.bf16.msra.mxu1 %v1770_v42 }
 0xa04   :  { %4194 = vmatprep.subr.bf16.mxu1 %v1769_v45 }
 0xa07   :  { %4195 = vmatpush3.bf16.msra.mxu1 %v1769_v45 }
 0xa08   :  { %4196 = vmatprep.subr.bf16.mxu1 %v1768_v44 }
 0xa0b   :  { %4197 = vmatpush3.bf16.msra.mxu1 %v1768_v44 }
 0xa0c   :  { %4198 = vmatprep.subr.bf16.mxu1 %v1767_v46 }
 0xa0f   :  { %4199 = vmatpush3.bf16.msra.mxu1 %v1767_v46 }
 0xa10   :  { %4200 = vmatprep.subr.bf16.mxu1 %v1766_v47 }
 0xa13   :  { %4201 = vmatpush3.bf16.msra.mxu1 %v1766_v47 }
 0xa14   :  { %4202 = vmatprep.subr.bf16.mxu1 %v1765_v48 }
 0xa17   :  { %4203 = vmatpush3.bf16.msra.mxu1 %v1765_v48 }
 0xa18   :  { %4204 = vmatprep.subr.bf16.mxu1 %v1764_v49 }
 0xa1b   :  { %4205 = vmatpush3.bf16.msra.mxu1 %v1764_v49 }
 0xa1c   :  { %4206 = vmatprep.subr.bf16.mxu1 %v1763_v62 }
 0xa1f   :  { %4207 = vmatpush3.bf16.msra.mxu1 %v1763_v62 }
 0xa22   :  { %4209 = vmatmul.mubr.bf16.vlgmr.msra.gmra.mxu1 %v4944_v9 }
 0xa23   :  { %4212 = vmatprep.mubr.bf16.mxu1 %v4950_v11 }
 0xa2a   :  { %4213 = vmatmul.mubr.bf16.gmra.mxu1 %v4956_v10 }
 0xa2b   :  { %4216 = vmatprep.mubr.bf16.mxu1 %v4962_v12 }
 0xa32   :  { %4217 = vmatmul.mubr.bf16.gmra.mxu1 %v4968_v13 }
 0xa33   :  { %4220 = vmatprep.mubr.bf16.mxu1 %v4974_v14 }
 0xa3a   :  { %4221 = vmatmul.mubr.bf16.gmra.mxu1 %v4980_v15 }
 0xa3b   :  { %4272 = vmatprep.mubr.bf16.mxu1 %v4986_v16 }
 0xae2   :  { %v4210_v1 = vpop.f32.mrf.mxu1 }
 0xae3   :  { %v1820_v52 = vadd.f32 %v4210_v1, %v3415_v3 }
 0xae4   :  { %v1811_v2 = vpop.f32.mrf.mxu1 }
 0xae5   :  { %v1812_v50 = vadd.f32 %v3415_v3, %v1811_v2  ;;  %v1876_v59 = vmax.f32 %v1820_v52, 0.0  ;;  %v4544_v2 = vld [vmem:[%s5359_s2 + $0x1f8] sm:$0xff]  }
 0xae6   :  { %v4211_v4 = vpop.f32.mrf.mxu1  ;;  %4288 = vmatprep.subr.bf16.mxu0 %v4544_v2 }
 0xae7   :  { %v1823_v51 = vadd.f32 %v4211_v4, %v3415_v3  ;;  %v1874_v57 = vmax.f32 %v1812_v50, 0.0  ;;  %v4545_v4 = vld [vmem:[%s5359_s2 + $0x1f0] sm:$0xff]   ;;  %v4547_v50 = vld [vmem:[%s5359_s2 + $0x1e0] sm:$0xff]  }
 0xae8   :  { %v1814_v53 = vpop.f32.mrf.mxu1 }
 0xae9   :  { %v1815_v54 = vadd.f32 %v3415_v3, %v1814_v53  ;;  %v1877_v55 = vmax.f32 %v1823_v51, 0.0  ;;  %v4548_v51 = vld [vmem:[%s5359_s2 + $0x1d8] sm:$0xff]  }
 0xaea   :  { %v4214_v56 = vpop.f32.mrf.mxu1 }
 0xaeb   :  { %v1875_v58 = vmax.f32 %v1815_v54, 0.0  ;;  %v1910_v5 = vpack.c.bf16 %v1877_v55, %v1876_v59  ;;  %v1836_v17 = vadd.f32 %v4214_v56, %v3415_v3 }
 0xaec   :  { %v1827_v60 = vpop.f32.mrf.mxu1 }
 0xaed   :  { %v1909_v61 = vpack.c.bf16 %v1875_v58, %v1874_v57  ;;  %v1828_v7 = vadd.f32 %v3415_v3, %v1827_v60  ;;  %v1880_v24 = vmax.f32 %v1836_v17, 0.0 }
 0xaee   :  { %v4215_v6 = vpop.f32.mrf.mxu1 }
 0xaef   :  { %v1839_v8 = vadd.f32 %v4215_v6, %v3415_v3  ;;  %4240 = vmatprep.mubr.bf16.mxu0 %v1909_v61  ;;  %v1878_v23 = vmax.f32 %v1828_v7, 0.0 }
 0xaf0   :  { %v1830_v18 = vpop.f32.mrf.mxu1  ;;  %4241 = vmatmul.mubr.bf16.vlgmr.msra.gmra.mxu0 %v1910_v5 }
 0xaf1   :  { %v1831_v19 = vadd.f32 %v3415_v3, %v1830_v18  ;;  %v1881_v21 = vmax.f32 %v1839_v8, 0.0  ;;  %4289 = vmatpush3.bf16.msra.mxu0 %v4544_v2 }
 0xaf2   :  { %v4218_v20 = vpop.f32.mrf.mxu1  ;;  %4290 = vmatprep.subr.bf16.mxu0 %v4545_v4 }
 0xaf3   :  { %v1879_v22 = vmax.f32 %v1831_v19, 0.0  ;;  %v1912_v27 = vpack.c.bf16 %v1881_v21, %v1880_v24  ;;  %v1852_v31 = vadd.f32 %v4218_v20, %v3415_v3 }
 0xaf4   :  { %v1843_v25 = vpop.f32.mrf.mxu1 }
 0xaf5   :  { %v1911_v26 = vpack.c.bf16 %v1879_v22, %v1878_v23  ;;  %v1844_v29 = vadd.f32 %v3415_v3, %v1843_v25  ;;  %v1884_v39 = vmax.f32 %v1852_v31, 0.0  ;;  %4291 = vmatpush3.bf16.msra.mxu0 %v4545_v4 }
 0xaf6   :  { %v4219_v28 = vpop.f32.mrf.mxu1 }
 0xaf7   :  { %v1855_v30 = vadd.f32 %v4219_v28, %v3415_v3  ;;  %4244 = vmatprep.mubr.bf16.mxu0 %v1911_v26  ;;  %v1882_v37 = vmax.f32 %v1844_v29, 0.0  ;;  %v4550_v28 = vld [vmem:[%s5359_s2 + $0x1c8] sm:$0xff]   ;;  %v4551_v29 = vld [vmem:[%s5359_s2 + $0x1c0] sm:$0xff]  }
 0xaf8   :  { %v1846_v33 = vpop.f32.mrf.mxu1  ;;  %4245 = vmatmul.mubr.bf16.gmra.mxu0 %v1912_v27  ;;  %v4549_v27 = vld [vmem:[%s5359_s2 + $0x1d0] sm:$0xff]  }
 0xaf9   :  { %v1847_v34 = vadd.f32 %v3415_v3, %v1846_v33  ;;  %v1885_v35 = vmax.f32 %v1855_v30, 0.0  ;;  %v3441_v33 = vld [vmem:[%s5362_s3 + $0x6] ss:$0 sm:$0xff] }
 0xafa   :  { %v4222_v36 = vpop.f32.mrf.mxu1 }
 0xafb   :  { %v1883_v38 = vmax.f32 %v1847_v34, 0.0  ;;  %v1914_v42 = vpack.c.bf16 %v1885_v35, %v1884_v39  ;;  %v1868_v46 = vadd.f32 %v4222_v36, %v3415_v3 }
 0xafc   :  { %v1859_v40 = vpop.f32.mrf.mxu1 }
 0xafd   :  { %v1913_v41 = vpack.c.bf16 %v1883_v38, %v1882_v37  ;;  %v1860_v45 = vadd.f32 %v3415_v3, %v1859_v40  ;;  %v1888_v0 = vmax.f32 %v1868_v46, 0.0 }
 0xafe   :  { %v4223_v43 = vpop.f32.mrf.mxu1 }
 0xaff   :  { %v1871_v44 = vadd.f32 %v4223_v43, %v3415_v3  ;;  %4248 = vmatprep.mubr.bf16.mxu0 %v1913_v41  ;;  %v1886_v62 = vmax.f32 %v1860_v45, 0.0 }
 0xb00   :  { %v1862_v47 = vpop.f32.mrf.mxu1  ;;  %4249 = vmatmul.mubr.bf16.gmra.mxu0 %v1914_v42 }
 0xb01   :  { %v1863_v48 = vadd.f32 %v3415_v3, %v1862_v47  ;;  %v1889_v49 = vmax.f32 %v1871_v44, 0.0  ;;  %v4546_v3 = vld [vmem:[%s5359_s2 + $0x1e8] sm:$0xff]  }
 0xb02   :  { %4292 = vmatprep.subr.bf16.mxu0 %v4546_v3 }
 0xb03   :  { %v1887_v63 = vmax.f32 %v1863_v48, 0.0  ;;  %v1916_v1 = vpack.c.bf16 %v1889_v49, %v1888_v0  ;;  %4293 = vmatpush3.bf16.msra.mxu0 %v4546_v3 }
 0xb04   :  { %4294 = vmatprep.subr.bf16.mxu0 %v4547_v50 }
 0xb05   :  { %v1915_v32 = vpack.c.bf16 %v1887_v63, %v1886_v62 }
 0xb07   :  { %4252 = vmatprep.mubr.bf16.mxu0 %v1915_v32  ;;  %4295 = vmatpush3.bf16.msra.mxu0 %v4547_v50 }
 0xb08   :  { %4253 = vmatmul.mubr.bf16.gmra.mxu0 %v1916_v1  ;;  %4296 = vmatprep.subr.bf16.mxu0 %v4548_v51 }
 0xb0b   :  { %4297 = vmatpush3.bf16.msra.mxu0 %v4548_v51 }
 0xb0c   :  { %4298 = vmatprep.subr.bf16.mxu0 %v4549_v27 }
 0xb0f   :  { %4299 = vmatpush3.bf16.msra.mxu0 %v4549_v27 }
 0xb10   :  { %4300 = vmatprep.subr.bf16.mxu0 %v4550_v28 }
 0xb13   :  { %4301 = vmatpush3.bf16.msra.mxu0 %v4550_v28 }
 0xb14   :  { %4302 = vmatprep.subr.bf16.mxu0 %v4551_v29 }
 0xb17   :  { %4303 = vmatpush3.bf16.msra.mxu0 %v4551_v29 }
 0xbb0   :  { %v4242_v52 = vpop.f32.mrf.mxu0 }
 0xbb2   :  { %v1999_v53 = vpop.f32.mrf.mxu0 }
 0xbb4   :  { %v4243_v54 = vpop.f32.mrf.mxu0 }
 0xbb5   :  { %v2063_v25 = vpack.c.bf16 %v4243_v54, %v4242_v52 }
 0xbb6   :  { %v2002_v55 = vpop.f32.mrf.mxu0 }
 0xbb7   :  { %v2062_v26 = vpack.c.bf16 %v2002_v55, %v1999_v53 }
 0xbb8   :  { %v4246_v56 = vpop.f32.mrf.mxu0 }
 0xbba   :  { %v2015_v57 = vpop.f32.mrf.mxu0 }
 0xbbc   :  { %v4247_v58 = vpop.f32.mrf.mxu0 }
 0xbbd   :  { %v2065_v22 = vpack.c.bf16 %v4247_v58, %v4246_v56 }
 0xbbe   :  { %v2018_v59 = vpop.f32.mrf.mxu0 }
 0xbbf   :  { %v2064_v24 = vpack.c.bf16 %v2018_v59, %v2015_v57 }
 0xbc0   :  { %v4250_v60 = vpop.f32.mrf.mxu0 }
 0xbc2   :  { %v2031_v61 = vpop.f32.mrf.mxu0 }
 0xbc4   :  { %v4251_v5 = vpop.f32.mrf.mxu0 }
 0xbc5   :  { %v2067_v20 = vpack.c.bf16 %v4251_v5, %v4250_v60 }
 0xbc6   :  { %v2034_v6 = vpop.f32.mrf.mxu0 }
 0xbc7   :  { %v2066_v23 = vpack.c.bf16 %v2034_v6, %v2031_v61 }
 0xbc8   :  { %v4254_v7 = vpop.f32.mrf.mxu0 }
 0xbca   :  { %v2047_v8 = vpop.f32.mrf.mxu0 }
 0xbcc   :  { %v4255_v17 = vpop.f32.mrf.mxu0 }
 0xbcd   :  { %v2069_v18 = vpack.c.bf16 %v4255_v17, %v4254_v7 }
 0xbce   :  { %v2050_v19 = vpop.f32.mrf.mxu0 }
 0xbcf   :  { %v2068_v21 = vpack.c.bf16 %v2050_v19, %v2047_v8  ;;  %4256 = vmatprep.subr.bf16.mxu1 %v2069_v18 }
 0xbd0   :  { %4257 = vmatpush3.bf16.msra.mxu1 %v2069_v18 }
 0xbd1   :  { %4258 = vmatprep.subr.bf16.mxu1 %v2068_v21 }
 0xbd4   :  { %4259 = vmatpush3.bf16.msra.mxu1 %v2068_v21 }
 0xbd5   :  { %4260 = vmatprep.subr.bf16.mxu1 %v2067_v20 }
 0xbd8   :  { %4261 = vmatpush3.bf16.msra.mxu1 %v2067_v20 }
 0xbd9   :  { %4262 = vmatprep.subr.bf16.mxu1 %v2066_v23 }
 0xbdc   :  { %4263 = vmatpush3.bf16.msra.mxu1 %v2066_v23 }
 0xbdd   :  { %4264 = vmatprep.subr.bf16.mxu1 %v2065_v22 }
 0xbe0   :  { %4265 = vmatpush3.bf16.msra.mxu1 %v2065_v22 }
 0xbe1   :  { %4266 = vmatprep.subr.bf16.mxu1 %v2064_v24 }
 0xbe4   :  { %4267 = vmatpush3.bf16.msra.mxu1 %v2064_v24 }
 0xbe5   :  { %4268 = vmatprep.subr.bf16.mxu1 %v2063_v25 }
 0xbe8   :  { %4269 = vmatpush3.bf16.msra.mxu1 %v2063_v25 }
 0xbe9   :  { %4270 = vmatprep.subr.bf16.mxu1 %v2062_v26 }
 0xbec   :  { %4271 = vmatpush3.bf16.msra.mxu1 %v2062_v26 }
 0xbef   :  { %4273 = vmatmul.mubr.bf16.vlgmr.msra.gmra.mxu1 %v4944_v9 }
 0xbf0   :  { %4276 = vmatprep.mubr.bf16.mxu1 %v4950_v11 }
 0xbf7   :  { %4277 = vmatmul.mubr.bf16.gmra.mxu1 %v4956_v10 }
 0xbf8   :  { %4280 = vmatprep.mubr.bf16.mxu1 %v4962_v12 }
 0xbff   :  { %4281 = vmatmul.mubr.bf16.gmra.mxu1 %v4968_v13 }
 0xc00   :  { %4284 = vmatprep.mubr.bf16.mxu1 %v4974_v14 }
 0xc07   :  { %4285 = vmatmul.mubr.bf16.gmra.mxu1 %v4980_v15 }
 0xc08   :  { %4336 = vmatprep.mubr.bf16.mxu1 %v4986_v16 }
 0xcaf   :  { %v4274_v30 = vpop.f32.mrf.mxu1 }
 0xcb0   :  { %v2119_v37 = vadd.f32 %v4274_v30, %v3441_v33 }
 0xcb1   :  { %v2110_v31 = vpop.f32.mrf.mxu1 }
 0xcb2   :  { %v2111_v35 = vadd.f32 %v3441_v33, %v2110_v31  ;;  %v2175_v45 = vmax.f32 %v2119_v37, 0.0  ;;  %v4552_v31 = vld [vmem:[%s5359_s2 + $0x238] sm:$0xff]  }
 0xcb3   :  { %v4275_v34 = vpop.f32.mrf.mxu1  ;;  %4352 = vmatprep.subr.bf16.mxu0 %v4552_v31 }
 0xcb4   :  { %v2122_v36 = vadd.f32 %v4275_v34, %v3441_v33  ;;  %v2173_v42 = vmax.f32 %v2111_v35, 0.0  ;;  %v4553_v34 = vld [vmem:[%s5359_s2 + $0x230] sm:$0xff]   ;;  %v4555_v35 = vld [vmem:[%s5359_s2 + $0x220] sm:$0xff]  }
 0xcb5   :  { %v2113_v38 = vpop.f32.mrf.mxu1 }
 0xcb6   :  { %v2114_v39 = vadd.f32 %v3441_v33, %v2113_v38  ;;  %v2176_v40 = vmax.f32 %v2122_v36, 0.0  ;;  %v4556_v36 = vld [vmem:[%s5359_s2 + $0x218] sm:$0xff]  }
 0xcb7   :  { %v4278_v41 = vpop.f32.mrf.mxu1 }
 0xcb8   :  { %v2174_v43 = vmax.f32 %v2114_v39, 0.0  ;;  %v2209_v47 = vpack.c.bf16 %v2176_v40, %v2175_v45  ;;  %v2135_v63 = vadd.f32 %v4278_v41, %v3441_v33 }
 0xcb9   :  { %v2126_v44 = vpop.f32.mrf.mxu1 }
 0xcba   :  { %v2208_v46 = vpack.c.bf16 %v2174_v43, %v2173_v42  ;;  %v2127_v49 = vadd.f32 %v3441_v33, %v2126_v44  ;;  %v2179_v50 = vmax.f32 %v2135_v63, 0.0 }
 0xcbb   :  { %v4279_v48 = vpop.f32.mrf.mxu1 }
 0xcbc   :  { %v2138_v62 = vadd.f32 %v4279_v48, %v3441_v33  ;;  %4304 = vmatprep.mubr.bf16.mxu0 %v2208_v46  ;;  %v2177_v4 = vmax.f32 %v2127_v49, 0.0 }
 0xcbd   :  { %v2129_v0 = vpop.f32.mrf.mxu1  ;;  %4305 = vmatmul.mubr.bf16.vlgmr.msra.gmra.mxu0 %v2209_v47 }
 0xcbe   :  { %v2130_v32 = vadd.f32 %v3441_v33, %v2129_v0  ;;  %v2180_v1 = vmax.f32 %v2138_v62, 0.0  ;;  %4353 = vmatpush3.bf16.msra.mxu0 %v4552_v31 }
 0xcbf   :  { %v4282_v2 = vpop.f32.mrf.mxu1  ;;  %4354 = vmatprep.subr.bf16.mxu0 %v4553_v34 }
 0xcc0   :  { %v2178_v3 = vmax.f32 %v2130_v32, 0.0  ;;  %v2211_v53 = vpack.c.bf16 %v2180_v1, %v2179_v50  ;;  %v2151_v57 = vadd.f32 %v4282_v2, %v3441_v33 }
 0xcc1   :  { %v2142_v51 = vpop.f32.mrf.mxu1 }
 0xcc2   :  { %v2210_v52 = vpack.c.bf16 %v2178_v3, %v2177_v4  ;;  %v2143_v55 = vadd.f32 %v3441_v33, %v2142_v51  ;;  %v2183_v7 = vmax.f32 %v2151_v57, 0.0  ;;  %4355 = vmatpush3.bf16.msra.mxu0 %v4553_v34 }
 0xcc3   :  { %v4283_v54 = vpop.f32.mrf.mxu1 }
 0xcc4   :  { %v2154_v56 = vadd.f32 %v4283_v54, %v3441_v33  ;;  %4308 = vmatprep.mubr.bf16.mxu0 %v2210_v52  ;;  %v2181_v5 = vmax.f32 %v2143_v55, 0.0 }
 0xcc5   :  { %v2145_v58 = vpop.f32.mrf.mxu1  ;;  %4309 = vmatmul.mubr.bf16.gmra.mxu0 %v2211_v53  ;;  %v4557_v53 = vld [vmem:[%s5359_s2 + $0x210] sm:$0xff]  }
 0xcc6   :  { %v2146_v59 = vadd.f32 %v3441_v33, %v2145_v58  ;;  %v2184_v60 = vmax.f32 %v2154_v56, 0.0 }
 0xcc7   :  { %v4286_v61 = vpop.f32.mrf.mxu1 }
 0xcc8   :  { %v2182_v6 = vmax.f32 %v2146_v59, 0.0  ;;  %v2213_v18 = vpack.c.bf16 %v2184_v60, %v2183_v7  ;;  %v2167_v23 = vadd.f32 %v4286_v61, %v3441_v33 }
 0xcc9   :  { %v2158_v8 = vpop.f32.mrf.mxu1 }
 0xcca   :  { %v2212_v17 = vpack.c.bf16 %v2182_v6, %v2181_v5  ;;  %v2159_v21 = vadd.f32 %v3441_v33, %v2158_v8  ;;  %v2187_v28 = vmax.f32 %v2167_v23, 0.0 }
 0xccb   :  { %v4287_v19 = vpop.f32.mrf.mxu1 }
 0xccc   :  { %v2170_v20 = vadd.f32 %v4287_v19, %v3441_v33  ;;  %4312 = vmatprep.mubr.bf16.mxu0 %v2212_v17  ;;  %v2185_v26 = vmax.f32 %v2159_v21, 0.0 }
 0xccd   :  { %v2161_v22 = vpop.f32.mrf.mxu1  ;;  %4313 = vmatmul.mubr.bf16.gmra.mxu0 %v2213_v18 }
 0xcce   :  { %v2162_v24 = vadd.f32 %v3441_v33, %v2161_v22  ;;  %v2188_v25 = vmax.f32 %v2170_v20, 0.0  ;;  %v4554_v33 = vld [vmem:[%s5359_s2 + $0x228] sm:$0xff]  }
 0xccf   :  { %4356 = vmatprep.subr.bf16.mxu0 %v4554_v33 }
 0xcd0   :  { %v2186_v27 = vmax.f32 %v2162_v24, 0.0  ;;  %v2215_v30 = vpack.c.bf16 %v2188_v25, %v2187_v28  ;;  %4357 = vmatpush3.bf16.msra.mxu0 %v4554_v33 }
 0xcd1   :  { %4358 = vmatprep.subr.bf16.mxu0 %v4555_v35 }
 0xcd2   :  { %v2214_v29 = vpack.c.bf16 %v2186_v27, %v2185_v26 }
 0xcd4   :  { %4316 = vmatprep.mubr.bf16.mxu0 %v2214_v29  ;;  %4359 = vmatpush3.bf16.msra.mxu0 %v4555_v35 }
 0xcd5   :  { %4317 = vmatmul.mubr.bf16.gmra.mxu0 %v2215_v30  ;;  %4360 = vmatprep.subr.bf16.mxu0 %v4556_v36 }
 0xcd8   :  { %4361 = vmatpush3.bf16.msra.mxu0 %v4556_v36 }
 0xcd9   :  { %4362 = vmatprep.subr.bf16.mxu0 %v4557_v53 }
 0xcdc   :  { %4363 = vmatpush3.bf16.msra.mxu0 %v4557_v53  ;;  %v4564_v53 = vld [vmem:[%s5359_s2 + $0x258] sm:$0xff]  }
 0xd7d   :  { %v4306_v37 = vpop.f32.mrf.mxu0 }
 0xd7f   :  { %v2298_v38 = vpop.f32.mrf.mxu0 }
 0xd81   :  { %v4307_v39 = vpop.f32.mrf.mxu0 }
 0xd82   :  { %v2362_v51 = vpack.c.bf16 %v4307_v39, %v4306_v37 }
 0xd83   :  { %v2301_v40 = vpop.f32.mrf.mxu0 }
 0xd84   :  { %v2361_v52 = vpack.c.bf16 %v2301_v40, %v2298_v38 }
 0xd85   :  { %v4310_v41 = vpop.f32.mrf.mxu0 }
 0xd87   :  { %v2314_v42 = vpop.f32.mrf.mxu0 }
 0xd89   :  { %v4311_v43 = vpop.f32.mrf.mxu0 }
 0xd8a   :  { %v2364_v3 = vpack.c.bf16 %v4311_v43, %v4310_v41 }
 0xd8b   :  { %v2317_v45 = vpop.f32.mrf.mxu0 }
 0xd8c   :  { %v2363_v50 = vpack.c.bf16 %v2317_v45, %v2314_v42 }
 0xd8d   :  { %v4314_v44 = vpop.f32.mrf.mxu0 }
 0xd8f   :  { %v2330_v46 = vpop.f32.mrf.mxu0 }
 0xd91   :  { %v4315_v47 = vpop.f32.mrf.mxu0 }
 0xd92   :  { %v2366_v2 = vpack.c.bf16 %v4315_v47, %v4314_v44 }
 0xd93   :  { %v2333_v48 = vpop.f32.mrf.mxu0 }
 0xd94   :  { %v2365_v4 = vpack.c.bf16 %v2333_v48, %v2330_v46 }
 0xd95   :  { %v4318_v49 = vpop.f32.mrf.mxu0 }
 0xd97   :  { %v2346_v62 = vpop.f32.mrf.mxu0 }
 0xd99   :  { %v4319_v63 = vpop.f32.mrf.mxu0 }
 0xd9a   :  { %v2368_v0 = vpack.c.bf16 %v4319_v63, %v4318_v49 }
 0xd9b   :  { %v2349_v32 = vpop.f32.mrf.mxu0 }
 0xd9c   :  { %v2367_v1 = vpack.c.bf16 %v2349_v32, %v2346_v62  ;;  %4320 = vmatprep.subr.bf16.mxu1 %v2368_v0 }
 0xd9d   :  { %4321 = vmatpush3.bf16.msra.mxu1 %v2368_v0 }
 0xd9e   :  { %4322 = vmatprep.subr.bf16.mxu1 %v2367_v1 }
 0xda1   :  { %4323 = vmatpush3.bf16.msra.mxu1 %v2367_v1 }
 0xda2   :  { %4324 = vmatprep.subr.bf16.mxu1 %v2366_v2 }
 0xda5   :  { %4325 = vmatpush3.bf16.msra.mxu1 %v2366_v2 }
 0xda6   :  { %4326 = vmatprep.subr.bf16.mxu1 %v2365_v4 }
 0xda9   :  { %4327 = vmatpush3.bf16.msra.mxu1 %v2365_v4 }
 0xdaa   :  { %4328 = vmatprep.subr.bf16.mxu1 %v2364_v3 }
 0xdad   :  { %4329 = vmatpush3.bf16.msra.mxu1 %v2364_v3  ;;  %v4560_v3 = vld [vmem:[%s5359_s2 + $0x278] sm:$0xff]  }
 0xdae   :  { %4330 = vmatprep.subr.bf16.mxu1 %v2363_v50 }
 0xdb1   :  { %4331 = vmatpush3.bf16.msra.mxu1 %v2363_v50  ;;  %v4561_v50 = vld [vmem:[%s5359_s2 + $0x270] sm:$0xff]  }
 0xdb2   :  { %4332 = vmatprep.subr.bf16.mxu1 %v2362_v51 }
 0xdb5   :  { %4333 = vmatpush3.bf16.msra.mxu1 %v2362_v51  ;;  %v4562_v51 = vld [vmem:[%s5359_s2 + $0x268] sm:$0xff]  }
 0xdb6   :  { %4334 = vmatprep.subr.bf16.mxu1 %v2361_v52 }
 0xdb9   :  { %4335 = vmatpush3.bf16.msra.mxu1 %v2361_v52  ;;  %v4563_v52 = vld [vmem:[%s5359_s2 + $0x260] sm:$0xff]  }
 0xdbc   :  { %4337 = vmatmul.mubr.bf16.vlgmr.msra.gmra.mxu1 %v4944_v9  ;;  %v4558_v9 = vld [vmem:[%s5359_s2 + $0x208] sm:$0xff]  }
 0xdbd   :  { %4340 = vmatprep.mubr.bf16.mxu1 %v4950_v11  ;;  %4364 = vmatprep.subr.bf16.mxu0 %v4558_v9  ;;  %v4559_v11 = vld [vmem:[%s5359_s2 + $0x200] sm:$0xff]  }
 0xdbe   :  { %4365 = vmatpush3.bf16.msra.mxu0 %v4558_v9 }
 0xdbf   :  { %4366 = vmatprep.subr.bf16.mxu0 %v4559_v11 }
 0xdc2   :  { %4367 = vmatpush3.bf16.msra.mxu0 %v4559_v11 }
 0xdc3   :  { %4416 = vmatprep.subr.bf16.mxu0 %v4560_v3 }
 0xdc4   :  { %4341 = vmatmul.mubr.bf16.gmra.mxu1 %v4956_v10 }
 0xdc5   :  { %4344 = vmatprep.mubr.bf16.mxu1 %v4962_v12 }
 0xdcc   :  { %4345 = vmatmul.mubr.bf16.gmra.mxu1 %v4968_v13  ;;  %v3467_v13 = vld [vmem:[%s5362_s3 + $0x7] ss:$0 sm:$0xff] }
 0xdcd   :  { %4348 = vmatprep.mubr.bf16.mxu1 %v4974_v14 }
 0xdd4   :  { %4349 = vmatmul.mubr.bf16.gmra.mxu1 %v4980_v15 }
 0xdd5   :  { %4400 = vmatprep.mubr.bf16.mxu1 %v4986_v16 }
 0xe7c   :  { %v4338_v10 = vpop.f32.mrf.mxu1 }
 0xe7d   :  { %v2418_v54 = vadd.f32 %v4338_v10, %v3467_v13 }
 0xe7e   :  { %v2409_v12 = vpop.f32.mrf.mxu1 }
 0xe7f   :  { %v2410_v15 = vadd.f32 %v3467_v13, %v2409_v12  ;;  %v2474_v61 = vmax.f32 %v2418_v54, 0.0 }
 0xe80   :  { %v4339_v14 = vpop.f32.mrf.mxu1 }
 0xe81   :  { %v2421_v16 = vadd.f32 %v4339_v14, %v3467_v13  ;;  %v2472_v59 = vmax.f32 %v2410_v15, 0.0 }
 0xe82   :  { %v2412_v55 = vpop.f32.mrf.mxu1 }
 0xe83   :  { %v2413_v56 = vadd.f32 %v3467_v13, %v2412_v55  ;;  %v2475_v57 = vmax.f32 %v2421_v16, 0.0 }
 0xe84   :  { %v4342_v58 = vpop.f32.mrf.mxu1 }
 0xe85   :  { %v2473_v60 = vmax.f32 %v2413_v56, 0.0  ;;  %v2508_v7 = vpack.c.bf16 %v2475_v57, %v2474_v61  ;;  %v2434_v19 = vadd.f32 %v4342_v58, %v3467_v13 }
 0xe86   :  { %v2425_v5 = vpop.f32.mrf.mxu1 }
 0xe87   :  { %v2507_v6 = vpack.c.bf16 %v2473_v60, %v2472_v59  ;;  %v2426_v17 = vadd.f32 %v3467_v13, %v2425_v5  ;;  %v2478_v26 = vmax.f32 %v2434_v19, 0.0 }
 0xe88   :  { %v4343_v8 = vpop.f32.mrf.mxu1 }
 0xe89   :  { %v2437_v18 = vadd.f32 %v4343_v8, %v3467_v13  ;;  %4368 = vmatprep.mubr.bf16.mxu0 %v2507_v6  ;;  %v2476_v24 = vmax.f32 %v2426_v17, 0.0 }
 0xe8a   :  { %v2428_v21 = vpop.f32.mrf.mxu1  ;;  %4369 = vmatmul.mubr.bf16.vlgmr.msra.gmra.mxu0 %v2508_v7 }
 0xe8b   :  { %v2429_v20 = vadd.f32 %v3467_v13, %v2428_v21  ;;  %v2479_v23 = vmax.f32 %v2437_v18, 0.0  ;;  %4417 = vmatpush3.bf16.msra.mxu0 %v4560_v3 }
 0xe8c   :  { %v4346_v22 = vpop.f32.mrf.mxu1  ;;  %4418 = vmatprep.subr.bf16.mxu0 %v4561_v50 }
 0xe8d   :  { %v2477_v25 = vmax.f32 %v2429_v20, 0.0  ;;  %v2510_v29 = vpack.c.bf16 %v2479_v23, %v2478_v26  ;;  %v2450_v33 = vadd.f32 %v4346_v22, %v3467_v13  ;;  %v5124_v20 = vld [vmem:[%s5361_s1 + $0x8] sm:$0xff]   ;;  %v5130_v23 = vld [vmem:[%s5361_s1 + $0x10] sm:$0xff]   ;;  %v5136_v22 = vld [vmem:[%s5361_s1 + $0x18] sm:$0xff]  }
 0xe8e   :  { %v2441_v27 = vpop.f32.mrf.mxu1  ;;  %v5154_v26 = vld [vmem:[%s5361_s1 + $0x30] sm:$0xff]  }
 0xe8f   :  { %v2509_v28 = vpack.c.bf16 %v2477_v25, %v2476_v24  ;;  %v2442_v31 = vadd.f32 %v3467_v13, %v2441_v27  ;;  %v2482_v41 = vmax.f32 %v2450_v33, 0.0  ;;  %4419 = vmatpush3.bf16.msra.mxu0 %v4561_v50  ;;  %v5142_v24 = vld [vmem:[%s5361_s1 + $0x20] sm:$0xff]   ;;  %v5148_v25 = vld [vmem:[%s5361_s1 + $0x28] sm:$0xff]   ;;  %v5160_v27 = vld [vmem:[%s5361_s1 + $0x38] sm:$0xff]  }
 0xe90   :  { %v4347_v30 = vpop.f32.mrf.mxu1  ;;  %4420 = vmatprep.subr.bf16.mxu0 %v4562_v51 }
 0xe91   :  { %v2453_v34 = vadd.f32 %v4347_v30, %v3467_v13  ;;  %4372 = vmatprep.mubr.bf16.mxu0 %v2509_v28  ;;  %v2480_v39 = vmax.f32 %v2442_v31, 0.0  ;;  %v4647_v28 = vld [vmem:[%s5361_s1] sm:$0xff]   ;;  %v4566_v30 = vld [vmem:[%s5359_s2 + $0x248] sm:$0xff]  }
 0xe92   :  { %v2444_v35 = vpop.f32.mrf.mxu1  ;;  %4373 = vmatmul.mubr.bf16.gmra.mxu0 %v2510_v29  ;;  %v4565_v29 = vld [vmem:[%s5359_s2 + $0x250] sm:$0xff]   ;;  %v4567_v31 = vld [vmem:[%s5359_s2 + $0x240] sm:$0xff]  }
 0xe93   :  { %v2445_v36 = vadd.f32 %v3467_v13, %v2444_v35  ;;  %v2483_v37 = vmax.f32 %v2453_v34, 0.0  ;;  %4421 = vmatpush3.bf16.msra.mxu0 %v4562_v51  ;;  %v3493_v35 = vld [vmem:[%s5362_s3 + $0x8] ss:$0 sm:$0xff] }
 0xe94   :  { %v4350_v38 = vpop.f32.mrf.mxu1  ;;  %4422 = vmatprep.subr.bf16.mxu0 %v4563_v52 }
 0xe95   :  { %v2481_v40 = vmax.f32 %v2445_v36, 0.0  ;;  %v2512_v45 = vpack.c.bf16 %v2483_v37, %v2482_v41  ;;  %v2466_v48 = vadd.f32 %v4350_v38, %v3467_v13 }
 0xe96   :  { %v2457_v42 = vpop.f32.mrf.mxu1 }
 0xe97   :  { %v2511_v43 = vpack.c.bf16 %v2481_v40, %v2480_v39  ;;  %v2458_v46 = vadd.f32 %v3467_v13, %v2457_v42  ;;  %v2486_v1 = vmax.f32 %v2466_v48, 0.0  ;;  %4423 = vmatpush3.bf16.msra.mxu0 %v4563_v52 }
 0xe98   :  { %v4351_v44 = vpop.f32.mrf.mxu1  ;;  %4424 = vmatprep.subr.bf16.mxu0 %v4564_v53 }
 0xe99   :  { %v2469_v47 = vadd.f32 %v4351_v44, %v3467_v13  ;;  %4376 = vmatprep.mubr.bf16.mxu0 %v2511_v43  ;;  %v2484_v0 = vmax.f32 %v2458_v46, 0.0 }
 0xe9a   :  { %v2460_v49 = vpop.f32.mrf.mxu1  ;;  %4377 = vmatmul.mubr.bf16.gmra.mxu0 %v2512_v45 }
 0xe9b   :  { %v2461_v62 = vadd.f32 %v3467_v13, %v2460_v49  ;;  %v2487_v63 = vmax.f32 %v2469_v47, 0.0  ;;  %4425 = vmatpush3.bf16.msra.mxu0 %v4564_v53 }
 0xe9c   :  { %4426 = vmatprep.subr.bf16.mxu0 %v4565_v29 }
 0xe9d   :  { %v2485_v32 = vmax.f32 %v2461_v62, 0.0  ;;  %v2514_v4 = vpack.c.bf16 %v2487_v63, %v2486_v1 }
 0xe9f   :  { %v2513_v2 = vpack.c.bf16 %v2485_v32, %v2484_v0  ;;  %4427 = vmatpush3.bf16.msra.mxu0 %v4565_v29 }
 0xea0   :  { %4428 = vmatprep.subr.bf16.mxu0 %v4566_v30 }
 0xea1   :  { %4380 = vmatprep.mubr.bf16.mxu0 %v2513_v2 }
 0xea2   :  { %4381 = vmatmul.mubr.bf16.gmra.mxu0 %v2514_v4 }
 0xea3   :  { %4429 = vmatpush3.bf16.msra.mxu0 %v4566_v30 }
 0xea4   :  { %4430 = vmatprep.subr.bf16.mxu0 %v4567_v31 }
 0xea7   :  { %4431 = vmatpush3.bf16.msra.mxu0 %v4567_v31 }
 0xf4a   :  { %v4370_v9 = vpop.f32.mrf.mxu0 }
 0xf4c   :  { %v2597_v11 = vpop.f32.mrf.mxu0 }
 0xf4e   :  { %v4371_v10 = vpop.f32.mrf.mxu0 }
 0xf4f   :  { %v2661_v19 = vpack.c.bf16 %v4371_v10, %v4370_v9 }
 0xf50   :  { %v2600_v12 = vpop.f32.mrf.mxu0 }
 0xf51   :  { %v2660_v21 = vpack.c.bf16 %v2600_v12, %v2597_v11 }
 0xf52   :  { %v4374_v13 = vpop.f32.mrf.mxu0 }
 0xf54   :  { %v2613_v14 = vpop.f32.mrf.mxu0 }
 0xf56   :  { %v4375_v15 = vpop.f32.mrf.mxu0 }
 0xf57   :  { %v2663_v17 = vpack.c.bf16 %v4375_v15, %v4374_v13 }
 0xf58   :  { %v2616_v16 = vpop.f32.mrf.mxu0 }
 0xf59   :  { %v2662_v18 = vpack.c.bf16 %v2616_v16, %v2613_v14 }
 0xf5a   :  { %v4378_v54 = vpop.f32.mrf.mxu0 }
 0xf5c   :  { %v2629_v55 = vpop.f32.mrf.mxu0 }
 0xf5e   :  { %v4379_v56 = vpop.f32.mrf.mxu0 }
 0xf5f   :  { %v2665_v7 = vpack.c.bf16 %v4379_v56, %v4378_v54 }
 0xf60   :  { %v2632_v57 = vpop.f32.mrf.mxu0 }
 0xf61   :  { %v2664_v8 = vpack.c.bf16 %v2632_v57, %v2629_v55 }
 0xf62   :  { %v4382_v58 = vpop.f32.mrf.mxu0 }
 0xf64   :  { %v2645_v59 = vpop.f32.mrf.mxu0 }
 0xf66   :  { %v4383_v60 = vpop.f32.mrf.mxu0 }
 0xf67   :  { %v2667_v61 = vpack.c.bf16 %v4383_v60, %v4382_v58 }
 0xf68   :  { %v2648_v5 = vpop.f32.mrf.mxu0 }
 0xf69   :  { %v2666_v6 = vpack.c.bf16 %v2648_v5, %v2645_v59  ;;  %4384 = vmatprep.subr.bf16.mxu1 %v2667_v61 }
 0xf6a   :  { %4385 = vmatpush3.bf16.msra.mxu1 %v2667_v61 }
 0xf6b   :  { %4386 = vmatprep.subr.bf16.mxu1 %v2666_v6 }
 0xf6e   :  { %4387 = vmatpush3.bf16.msra.mxu1 %v2666_v6 }
 0xf6f   :  { %4388 = vmatprep.subr.bf16.mxu1 %v2665_v7 }
 0xf72   :  { %4389 = vmatpush3.bf16.msra.mxu1 %v2665_v7 }
 0xf73   :  { %4390 = vmatprep.subr.bf16.mxu1 %v2664_v8 }
 0xf76   :  { %4391 = vmatpush3.bf16.msra.mxu1 %v2664_v8 }
 0xf77   :  { %4392 = vmatprep.subr.bf16.mxu1 %v2663_v17 }
 0xf7a   :  { %4393 = vmatpush3.bf16.msra.mxu1 %v2663_v17 }
 0xf7b   :  { %4394 = vmatprep.subr.bf16.mxu1 %v2662_v18 }
 0xf7e   :  { %4395 = vmatpush3.bf16.msra.mxu1 %v2662_v18 }
 0xf7f   :  { %4396 = vmatprep.subr.bf16.mxu1 %v2661_v19 }
 0xf82   :  { %4397 = vmatpush3.bf16.msra.mxu1 %v2661_v19 }
 0xf83   :  { %4398 = vmatprep.subr.bf16.mxu1 %v2660_v21 }
 0xf86   :  { %4399 = vmatpush3.bf16.msra.mxu1 %v2660_v21 }
 0xf89   :  { %4401 = vmatmul.mubr.bf16.vlgmr.msra.gmra.mxu1 %v5124_v20 }
 0xf8a   :  { %4404 = vmatprep.mubr.bf16.mxu1 %v5130_v23 }
 0xf91   :  { %4405 = vmatmul.mubr.bf16.gmra.mxu1 %v5136_v22 }
 0xf92   :  { %4408 = vmatprep.mubr.bf16.mxu1 %v5142_v24 }
 0xf99   :  { %4409 = vmatmul.mubr.bf16.gmra.mxu1 %v5148_v25 }
 0xf9a   :  { %4412 = vmatprep.mubr.bf16.mxu1 %v5154_v26 }
 0xfa1   :  { %4413 = vmatmul.mubr.bf16.gmra.mxu1 %v5160_v27 }
 0xfa2   :  { %4464 = vmatprep.mubr.bf16.mxu1 %v4647_v28 }
0x1049   :  { %v4402_v34 = vpop.f32.mrf.mxu1 }
0x104a   :  { %v2717_v39 = vadd.f32 %v4402_v34, %v3493_v35 }
0x104b   :  { %v2708_v33 = vpop.f32.mrf.mxu1 }
0x104c   :  { %v2709_v37 = vadd.f32 %v3493_v35, %v2708_v33  ;;  %v2773_v46 = vmax.f32 %v2717_v39, 0.0 }
0x104d   :  { %v4403_v36 = vpop.f32.mrf.mxu1 }
0x104e   :  { %v2720_v38 = vadd.f32 %v4403_v36, %v3493_v35  ;;  %v2771_v45 = vmax.f32 %v2709_v37, 0.0 }
0x104f   :  { %v2711_v40 = vpop.f32.mrf.mxu1 }
0x1050   :  { %v2712_v41 = vadd.f32 %v3493_v35, %v2711_v40  ;;  %v2774_v42 = vmax.f32 %v2720_v38, 0.0 }
0x1051   :  { %v4406_v43 = vpop.f32.mrf.mxu1 }
0x1052   :  { %v2772_v44 = vmax.f32 %v2712_v41, 0.0  ;;  %v2807_v49 = vpack.c.bf16 %v2774_v42, %v2773_v46  ;;  %v2733_v32 = vadd.f32 %v4406_v43, %v3493_v35 }
0x1053   :  { %v2724_v47 = vpop.f32.mrf.mxu1 }
0x1054   :  { %v2806_v48 = vpack.c.bf16 %v2772_v44, %v2771_v45  ;;  %v2725_v63 = vadd.f32 %v3493_v35, %v2724_v47  ;;  %v2777_v52 = vmax.f32 %v2733_v32, 0.0 }
0x1055   :  { %v4407_v62 = vpop.f32.mrf.mxu1 }
0x1056   :  { %v2736_v0 = vadd.f32 %v4407_v62, %v3493_v35  ;;  %4432 = vmatprep.mubr.bf16.mxu0 %v2806_v48  ;;  %v2775_v50 = vmax.f32 %v2725_v63, 0.0 }
0x1057   :  { %v2727_v1 = vpop.f32.mrf.mxu1  ;;  %4433 = vmatmul.mubr.bf16.vlgmr.msra.gmra.mxu0 %v2807_v49 }
0x1058   :  { %v2728_v2 = vadd.f32 %v3493_v35, %v2727_v1  ;;  %v2778_v4 = vmax.f32 %v2736_v0, 0.0 }
0x1059   :  { %v4410_v3 = vpop.f32.mrf.mxu1 }
0x105a   :  { %v2776_v51 = vmax.f32 %v2728_v2, 0.0  ;;  %v2809_v11 = vpack.c.bf16 %v2778_v4, %v2777_v52  ;;  %v2749_v14 = vadd.f32 %v4410_v3, %v3493_v35  ;;  %v3070_v3 = vlaneseq }
0x105b   :  { %v2740_v53 = vpop.f32.mrf.mxu1 }
0x105c   :  { %v2808_v9 = vpack.c.bf16 %v2776_v51, %v2775_v50  ;;  %v2741_v12 = vadd.f32 %v3493_v35, %v2740_v53  ;;  %v2781_v58 = vmax.f32 %v2749_v14, 0.0  ;;  %v5185_v50 = vand.u32 127, %v3070_v3  ;;  %v3519_v51 = vld [vmem:[%s5362_s3 + $0x9] ss:$0 sm:$0xff] }
0x105d   :  { %v4411_v10 = vpop.f32.mrf.mxu1 }
0x105e   :  { %v2752_v13 = vadd.f32 %v4411_v10, %v3493_v35  ;;  %4436 = vmatprep.mubr.bf16.mxu0 %v2808_v9  ;;  %v2779_v56 = vmax.f32 %v2741_v12, 0.0  ;;  %vm3072_vm0 = vcmp.lt.s32.totalorder %v5185_v50, 8 }
0x105f   :  { %v2743_v15 = vpop.f32.mrf.mxu1  ;;  %4437 = vmatmul.mubr.bf16.gmra.mxu0 %v2809_v11 }
0x1060   :  { %v2744_v16 = vadd.f32 %v3493_v35, %v2743_v15  ;;  %v2782_v54 = vmax.f32 %v2752_v13, 0.0 }
0x1061   :  { %v4414_v55 = vpop.f32.mrf.mxu1 }
0x1062   :  { %v2780_v57 = vmax.f32 %v2744_v16, 0.0  ;;  %v2811_v61 = vpack.c.bf16 %v2782_v54, %v2781_v58  ;;  %v2765_v8 = vadd.f32 %v4414_v55, %v3493_v35 }
0x1063   :  { %v2756_v59 = vpop.f32.mrf.mxu1 }
0x1064   :  { %v2810_v60 = vpack.c.bf16 %v2780_v57, %v2779_v56  ;;  %v2757_v6 = vadd.f32 %v3493_v35, %v2756_v59  ;;  %v2785_v29 = vmax.f32 %v2765_v8, 0.0 }
0x1065   :  { %v4415_v5 = vpop.f32.mrf.mxu1 }
0x1066   :  { %v2768_v7 = vadd.f32 %v4415_v5, %v3493_v35  ;;  %4440 = vmatprep.mubr.bf16.mxu0 %v2810_v60  ;;  %v2783_v21 = vmax.f32 %v2757_v6, 0.0 }
0x1067   :  { %v2759_v17 = vpop.f32.mrf.mxu1  ;;  %4441 = vmatmul.mubr.bf16.gmra.mxu0 %v2811_v61 }
0x1068   :  { %v2760_v18 = vadd.f32 %v3493_v35, %v2759_v17  ;;  %v2786_v19 = vmax.f32 %v2768_v7, 0.0 }
0x106a   :  { %v2784_v28 = vmax.f32 %v2760_v18, 0.0  ;;  %v2813_v31 = vpack.c.bf16 %v2786_v19, %v2785_v29 }
0x106c   :  { %v2812_v30 = vpack.c.bf16 %v2784_v28, %v2783_v21 }
0x106e   :  { %4444 = vmatprep.mubr.bf16.mxu0 %v2812_v30 }
0x106f   :  { %4445 = vmatmul.mubr.bf16.gmra.mxu0 %v2813_v31 }
0x1117   :  { %v4434_v34 = vpop.f32.mrf.mxu0 }
0x1119   :  { %v2896_v33 = vpop.f32.mrf.mxu0 }
0x111b   :  { %v4435_v36 = vpop.f32.mrf.mxu0 }
0x111c   :  { %v2960_v2 = vpack.c.bf16 %v4435_v36, %v4434_v34 }
0x111d   :  { %v2899_v37 = vpop.f32.mrf.mxu0 }
0x111e   :  { %v2959_v4 = vpack.c.bf16 %v2899_v37, %v2896_v33 }
0x111f   :  { %v4438_v38 = vpop.f32.mrf.mxu0 }
0x1121   :  { %v2912_v39 = vpop.f32.mrf.mxu0 }
0x1123   :  { %v4439_v40 = vpop.f32.mrf.mxu0 }
0x1124   :  { %v2962_v32 = vpack.c.bf16 %v4439_v40, %v4438_v38 }
0x1125   :  { %v2915_v41 = vpop.f32.mrf.mxu0 }
0x1126   :  { %v2961_v1 = vpack.c.bf16 %v2915_v41, %v2912_v39 }
0x1127   :  { %v4442_v42 = vpop.f32.mrf.mxu0 }
0x1129   :  { %v2928_v43 = vpop.f32.mrf.mxu0 }
0x112b   :  { %v4443_v45 = vpop.f32.mrf.mxu0 }
0x112c   :  { %v2964_v63 = vpack.c.bf16 %v4443_v45, %v4442_v42 }
0x112d   :  { %v2931_v35 = vpop.f32.mrf.mxu0 }
0x112e   :  { %v2963_v0 = vpack.c.bf16 %v2931_v35, %v2928_v43 }
0x112f   :  { %v4446_v44 = vpop.f32.mrf.mxu0 }
0x1131   :  { %v2944_v46 = vpop.f32.mrf.mxu0 }
0x1133   :  { %v4447_v47 = vpop.f32.mrf.mxu0 }
0x1134   :  { %v2966_v48 = vpack.c.bf16 %v4447_v47, %v4446_v44 }
0x1135   :  { %v2947_v49 = vpop.f32.mrf.mxu0 }
0x1136   :  { %v2965_v62 = vpack.c.bf16 %v2947_v49, %v2944_v46  ;;  %4448 = vmatprep.subr.bf16.mxu1 %v2966_v48 }
0x1137   :  { %4449 = vmatpush3.bf16.msra.mxu1 %v2966_v48 }
0x1138   :  { %4450 = vmatprep.subr.bf16.mxu1 %v2965_v62 }
0x113b   :  { %4451 = vmatpush3.bf16.msra.mxu1 %v2965_v62 }
0x113c   :  { %4452 = vmatprep.subr.bf16.mxu1 %v2964_v63 }
0x113f   :  { %4453 = vmatpush3.bf16.msra.mxu1 %v2964_v63 }
0x1140   :  { %4454 = vmatprep.subr.bf16.mxu1 %v2963_v0 }
0x1143   :  { %4455 = vmatpush3.bf16.msra.mxu1 %v2963_v0 }
0x1144   :  { %4456 = vmatprep.subr.bf16.mxu1 %v2962_v32 }
0x1147   :  { %4457 = vmatpush3.bf16.msra.mxu1 %v2962_v32 }
0x1148   :  { %4458 = vmatprep.subr.bf16.mxu1 %v2961_v1 }
0x114b   :  { %4459 = vmatpush3.bf16.msra.mxu1 %v2961_v1 }
0x114c   :  { %4460 = vmatprep.subr.bf16.mxu1 %v2960_v2 }
0x114f   :  { %4461 = vmatpush3.bf16.msra.mxu1 %v2960_v2 }
0x1150   :  { %4462 = vmatprep.subr.bf16.mxu1 %v2959_v4 }
0x1153   :  { %4463 = vmatpush3.bf16.msra.mxu1 %v2959_v4 }
0x1156   :  { %4465 = vmatmul.mubr.bf16.vlgmr.msra.gmra.mxu1 %v5124_v20 }
0x1157   :  { %4468 = vmatprep.mubr.bf16.mxu1 %v5130_v23 }
0x115e   :  { %4469 = vmatmul.mubr.bf16.gmra.mxu1 %v5136_v22 }
0x115f   :  { %4472 = vmatprep.mubr.bf16.mxu1 %v5142_v24 }
0x1166   :  { %4473 = vmatmul.mubr.bf16.gmra.mxu1 %v5148_v25 }
0x1167   :  { %4476 = vmatprep.mubr.bf16.mxu1 %v5154_v26 }
0x116e   :  { %4477 = vmatmul.mubr.bf16.gmra.mxu1 %v5160_v27 }
0x1216   :  { %v4466_v20 = vpop.f32.mrf.mxu1 }
0x1217   :  { %v3016_v23 = vadd.f32 %v4466_v20, %v3519_v51 }
0x1218   :  { %v3007_v22 = vpop.f32.mrf.mxu1 }
0x1219   :  { %v3008_v52 = vadd.f32 %v3519_v51, %v3007_v22  ;;  %v3075_v24 = vsel %vm3072_vm0, %v3016_v23, -1e+30 }
0x121a   :  { %3093 = vmax.xlane.f32.xlu1 %v3075_v24  ;;  %v4467_v25 = vpop.f32.mrf.mxu1 }
0x121b   :  { %v3019_v26 = vadd.f32 %v4467_v25, %v3519_v51  ;;  %v3073_v27 = vsel %vm3072_vm0, %v3008_v52, -1e+30 }
0x121c   :  { %v3010_v53 = vpop.f32.mrf.mxu1  ;;  %3089 = vmax.xlane.f32.xlu0 %v3073_v27 }
0x121d   :  { %v3011_v9 = vadd.f32 %v3519_v51, %v3010_v53  ;;  %v3076_v11 = vsel %vm3072_vm0, %v3019_v26, -1e+30 }
0x121e   :  { %3095 = vmax.xlane.f32.xlu1 %v3076_v11  ;;  %v4470_v10 = vpop.f32.mrf.mxu1 }
0x121f   :  { %v3032_v12 = vadd.f32 %v4470_v10, %v3519_v51  ;;  %v3074_v13 = vsel %vm3072_vm0, %v3011_v9, -1e+30 }
0x1220   :  { %v3023_v14 = vpop.f32.mrf.mxu1  ;;  %3091 = vmax.xlane.f32.xlu0 %v3074_v13 }
0x1221   :  { %v3024_v16 = vadd.f32 %v3519_v51, %v3023_v14  ;;  %v3079_v55 = vsel %vm3072_vm0, %v3032_v12, -1e+30 }
0x1222   :  { %v4471_v15 = vpop.f32.mrf.mxu1 }
0x1223   :  { %v3035_v54 = vadd.f32 %v4471_v15, %v3519_v51  ;;  %v3077_v61 = vsel %vm3072_vm0, %v3024_v16, -1e+30 }
0x1224   :  { %v3026_v56 = vpop.f32.mrf.mxu1  ;;  %3101 = vmax.xlane.f32.xlu0 %v3079_v55 }
0x1225   :  { %v3027_v57 = vadd.f32 %v3519_v51, %v3026_v56  ;;  %v3080_v58 = vsel %vm3072_vm0, %v3035_v54, -1e+30 }
0x1226   :  { %3103 = vmax.xlane.f32.xlu1 %v3080_v58  ;;  %v4474_v59 = vpop.f32.mrf.mxu1 }
0x1227   :  { %v3048_v60 = vadd.f32 %v4474_v59, %v3519_v51  ;;  %v3078_v6 = vsel %vm3072_vm0, %v3027_v57, -1e+30 }
0x1228   :  { %v3039_v5 = vpop.f32.mrf.mxu1  ;;  %3097 = vmax.xlane.f32.xlu0 %v3077_v61 }
0x1229   :  { %v3040_v8 = vadd.f32 %v3519_v51, %v3039_v5  ;;  %v3083_v18 = vsel %vm3072_vm0, %v3048_v60, -1e+30 }
0x122a   :  { %v4475_v7 = vpop.f32.mrf.mxu1  ;;  %3099 = vmax.xlane.f32.xlu1 %v3078_v6 }
0x122b   :  { %v3051_v17 = vadd.f32 %v4475_v7, %v3519_v51  ;;  %v5213_v30 = vsel %vm3072_vm0, %v3040_v8, -1e+30 }
0x122c   :  { %v3042_v19 = vpop.f32.mrf.mxu1  ;;  %3109 = vmax.xlane.f32.xlu0 %v3083_v18 }
0x122d   :  { %v3043_v21 = vadd.f32 %v3519_v51, %v3042_v19  ;;  %v3084_v28 = vsel %vm3072_vm0, %v3051_v17, -1e+30 }
0x122e   :  { %v4478_v29 = vpop.f32.mrf.mxu1  ;;  %3111 = vmax.xlane.f32.xlu1 %v3084_v28 }
0x122f   :  { %v5218_v33 = vsel %vm3072_vm0, %v3043_v21, -1e+30  ;;  %v3064_v37 = vadd.f32 %v4478_v29, %v3519_v51 }
0x1230   :  { %v3055_v31 = vpop.f32.mrf.mxu1  ;;  %3105 = vmax.xlane.f32.xlu0 %v5213_v30 }
0x1231   :  { %v3056_v34 = vadd.f32 %v3519_v51, %v3055_v31  ;;  %v5232_v43 = vsel %vm3072_vm0, %v3064_v37, -1e+30 }
0x1232   :  { %v4479_v36 = vpop.f32.mrf.mxu1  ;;  %3107 = vmax.xlane.f32.xlu1 %v5218_v33 }
0x1233   :  { %v5223_v38 = vsel %vm3072_vm0, %v3056_v34, -1e+30  ;;  %v3067_v41 = vadd.f32 %v4479_v36, %v3519_v51 }
0x1234   :  { %v3058_v39 = vpop.f32.mrf.mxu1  ;;  %3113 = vmax.xlane.f32.xlu0 %v5223_v38 }
0x1235   :  { %v3059_v40 = vadd.f32 %v3519_v51, %v3058_v39  ;;  %v5238_v45 = vsel %vm3072_vm0, %v3067_v41, -1e+30 }
0x1237   :  { %v5228_v42 = vsel %vm3072_vm0, %v3059_v40, -1e+30 }
0x1238   :  { %3115 = vmax.xlane.f32.xlu1 %v5228_v42  ;;  %3117 = vmax.xlane.f32.xlu0 %v5232_v43 }
0x123c   :  { %3119 = vmax.xlane.f32.xlu1 %v5238_v45 }
0x12a3   :  { %v3094_v35 = vpop.xlane.xlu1 %3093 }
0x12a4   :  { %v5241_v44 = vsub.f32 %v3075_v24, %v3094_v35 }
0x12a5   :  { %v3090_v46 = vpop.xlane.xlu0 %3089 }
0x12a6   :  { %v3141_v47 = vmul.f32 1.442695, %v5241_v44  ;;  %v5244_v48 = vsub.f32 %v3073_v27, %v3090_v46 }
0x12a7   :  { %v3096_v49 = vpop.xlane.xlu1 %3095 }
0x12a8   :  { %4568 = vpow2.f32 %v3141_v47  ;;  %v3137_v62 = vmul.f32 1.442695, %v5244_v48  ;;  %v5247_v63 = vsub.f32 %v3076_v11, %v3096_v49 }
0x12a9   :  { %v3092_v0 = vpop.xlane.xlu0 %3091 }
0x12aa   :  { %v3143_v32 = vmul.f32 1.442695, %v5247_v63  ;;  %v5250_v1 = vsub.f32 %v3074_v13, %v3092_v0  ;;  %4570 = vpow2.f32 %v3137_v62 }
0x12ac   :  { %4572 = vpow2.f32 %v3143_v32  ;;  %v3139_v2 = vmul.f32 1.442695, %v5250_v1 }
0x12ad   :  { %v3102_v4 = vpop.xlane.xlu0 %3101 }
0x12ae   :  { %v5253_v3 = vsub.f32 %v3079_v55, %v3102_v4  ;;  %4574 = vpow2.f32 %v3139_v2 }
0x12af   :  { %v3104_v50 = vpop.xlane.xlu1 %3103 }
0x12b0   :  { %v3149_v51 = vmul.f32 1.442695, %v5253_v3  ;;  %v5256_v20 = vsub.f32 %v3080_v58, %v3104_v50 }
0x12b1   :  { %v3098_v23 = vpop.xlane.xlu0 %3097 }
0x12b2   :  { %4576 = vpow2.f32 %v3149_v51  ;;  %v3151_v22 = vmul.f32 1.442695, %v5256_v20  ;;  %v5259_v52 = vsub.f32 %v3077_v61, %v3098_v23 }
0x12b3   :  { %v3100_v24 = vpop.xlane.xlu1 %3099 }
0x12b4   :  { %4578 = vpow2.f32 %v3151_v22  ;;  %v3145_v25 = vmul.f32 1.442695, %v5259_v52  ;;  %v5262_v26 = vsub.f32 %v3078_v6, %v3100_v24 }
0x12b5   :  { %v4569_v27 = vpop.eup %4568  ;;  %v3110_v53 = vpop.xlane.xlu0 %3109 }
0x12b6   :  { %4580 = vpow2.f32 %v3145_v25  ;;  %v3147_v9 = vmul.f32 1.442695, %v5262_v26  ;;  %v5265_v11 = vsub.f32 %v3083_v18, %v3110_v53  ;;  %3173 = vadd.xlane.f32.xlu0 %v4569_v27 }
0x12b7   :  { %v3112_v10 = vpop.xlane.xlu1 %3111  ;;  %v4571_v12 = vpop.eup %4570 }
0x12b8   :  { %4582 = vpow2.f32 %v3147_v9  ;;  %v3157_v13 = vmul.f32 1.442695, %v5265_v11  ;;  %v5268_v14 = vsub.f32 %v3084_v28, %v3112_v10 }
0x12b9   :  { %v4573_v15 = vpop.eup %4572  ;;  %v3106_v16 = vpop.xlane.xlu0 %3105 }
0x12ba   :  { %4584 = vpow2.f32 %v3157_v13  ;;  %v3159_v54 = vmul.f32 1.442695, %v5268_v14  ;;  %v5272_v55 = vsub.f32 %v5213_v30, %v3106_v16  ;;  %3175 = vadd.xlane.f32.xlu1 %v4573_v15  ;;  %3169 = vadd.xlane.f32.xlu0 %v4571_v12 }
0x12bb   :  { %v3108_v56 = vpop.xlane.xlu1 %3107  ;;  %v4575_v59 = vpop.eup %4574 }
0x12bc   :  { %4586 = vpow2.f32 %v3159_v54  ;;  %v3153_v57 = vmul.f32 1.442695, %v5272_v55  ;;  %v5276_v58 = vsub.f32 %v5218_v33, %v3108_v56 }
0x12bd   :  { %v3114_v60 = vpop.xlane.xlu0 %3113 }
0x12be   :  { %4588 = vpow2.f32 %v3153_v57  ;;  %v3155_v61 = vmul.f32 1.442695, %v5276_v58  ;;  %v5280_v5 = vsub.f32 %v5223_v38, %v3114_v60  ;;  %3171 = vadd.xlane.f32.xlu1 %v4575_v59 }
0x12bf   :  { %v4577_v6 = vpop.eup %4576 }
0x12c0   :  { %4590 = vpow2.f32 %v3155_v61  ;;  %v3161_v7 = vmul.f32 1.442695, %v5280_v5  ;;  %3181 = vadd.xlane.f32.xlu0 %v4577_v6 }
0x12c1   :  { %v4579_v8 = vpop.eup %4578  ;;  %v3116_v17 = vpop.xlane.xlu1 %3115 }
0x12c2   :  { %v3118_v18 = vpop.xlane.xlu0 %3117  ;;  %4592 = vpow2.f32 %v3161_v7  ;;  %v5284_v19 = vsub.f32 %v5228_v42, %v3116_v17  ;;  %3183 = vadd.xlane.f32.xlu1 %v4579_v8 }
0x12c3   :  { %v5287_v21 = vsub.f32 %v5232_v43, %v3118_v18  ;;  %v4581_v28 = vpop.eup %4580 }
0x12c4   :  { %v3163_v29 = vmul.f32 1.442695, %v5284_v19  ;;  %3177 = vadd.xlane.f32.xlu0 %v4581_v28 }
0x12c5   :  { %v3165_v30 = vmul.f32 1.442695, %v5287_v21  ;;  %v4583_v31 = vpop.eup %4582  ;;  %v3120_v34 = vpop.xlane.xlu1 %3119 }
0x12c6   :  { %4594 = vpow2.f32 %v3163_v29  ;;  %v5292_v33 = vsub.f32 %v5238_v45, %v3120_v34  ;;  %3179 = vadd.xlane.f32.xlu1 %v4583_v31 }
0x12c7   :  { %v4585_v36 = vpop.eup %4584  ;;  %4596 = vpow2.f32 %v3165_v30 }
0x12c8   :  { %v3167_v37 = vmul.f32 1.442695, %v5292_v33  ;;  %3189 = vadd.xlane.f32.xlu0 %v4585_v36 }
0x12c9   :  { %v4587_v38 = vpop.eup %4586 }
0x12ca   :  { %4598 = vpow2.f32 %v3167_v37  ;;  %3191 = vadd.xlane.f32.xlu1 %v4587_v38 }
0x12cb   :  { %v4589_v39 = vpop.eup %4588 }
0x12cc   :  { %3185 = vadd.xlane.f32.xlu0 %v4589_v39 }
0x12cd   :  { %v4591_v40 = vpop.eup %4590 }
0x12ce   :  { %3187 = vadd.xlane.f32.xlu1 %v4591_v40 }
0x12cf   :  { %v4593_v41 = vpop.eup %4592 }
0x12d0   :  { %3193 = vadd.xlane.f32.xlu0 %v4593_v41 }
0x12d3   :  { %v4595_v42 = vpop.eup %4594 }
0x12d4   :  { %v4597_v43 = vpop.eup %4596  ;;  %3195 = vadd.xlane.f32.xlu1 %v4595_v42 }
0x12d5   :  { %3197 = vadd.xlane.f32.xlu0 %v4597_v43 }
0x12d7   :  { %v4599_v45 = vpop.eup %4598 }
0x12d8   :  { %3199 = vadd.xlane.f32.xlu1 %v4599_v45 }
0x133f   :  { %v3174_v35 = vpop.xlane.xlu0 %3173 }
0x1340   :  { %4600 = vlog2.f32 %v3174_v35 }
0x1343   :  { %v3176_v46 = vpop.xlane.xlu1 %3175  ;;  %v3170_v47 = vpop.xlane.xlu0 %3169 }
0x1344   :  { %4602 = vlog2.f32 %v3176_v46 }
0x1345   :  { %4604 = vlog2.f32 %v3170_v47 }
0x1347   :  { %v3172_v49 = vpop.xlane.xlu1 %3171 }
0x1348   :  { %4606 = vlog2.f32 %v3172_v49 }
0x1349   :  { %v3182_v62 = vpop.xlane.xlu0 %3181 }
0x134a   :  { %4608 = vlog2.f32 %v3182_v62 }
0x134b   :  { %v3184_v0 = vpop.xlane.xlu1 %3183 }
0x134c   :  { %4610 = vlog2.f32 %v3184_v0 }
0x134d   :  { %v4601_v32 = vpop.eup %4600  ;;  %v3178_v2 = vpop.xlane.xlu0 %3177 }
0x134e   :  { %v3206_v4 = vmul.f32 0.6931472, %v4601_v32  ;;  %4612 = vlog2.f32 %v3178_v2 }
0x134f   :  { %v3180_v50 = vpop.xlane.xlu1 %3179 }
0x1350   :  { %v3235_v51 = vsub.f32 %v5241_v44, %v3206_v4  ;;  %4614 = vlog2.f32 %v3180_v50 }
0x1351   :  { %v4603_v23 = vpop.eup %4602  ;;  %v3190_v22 = vpop.xlane.xlu0 %3189 }
0x1352   :  { %v4605_v24 = vpop.eup %4604  ;;  %3251 = vst [vmem:[%s5363_s4 + $0x10] sm:$0xff] %v3235_v51  ;;  %v3208_v25 = vmul.f32 0.6931472, %v4603_v23  ;;  %4616 = vlog2.f32 %v3190_v22 }
0x1353   :  { %v3202_v27 = vmul.f32 0.6931472, %v4605_v24  ;;  %v3192_v53 = vpop.xlane.xlu1 %3191 }
0x1354   :  { %v3236_v9 = vsub.f32 %v5247_v63, %v3208_v25  ;;  %4618 = vlog2.f32 %v3192_v53 }
0x1355   :  { %v4607_v10 = vpop.eup %4606  ;;  %v3233_v12 = vsub.f32 %v5244_v48, %v3202_v27  ;;  %v3186_v13 = vpop.xlane.xlu0 %3185 }
0x1356   :  { %3252 = vst [vmem:[%s5363_s4 + $0x18] sm:$0xff] %v3236_v9  ;;  %v3204_v44 = vmul.f32 0.6931472, %v4607_v10  ;;  %4620 = vlog2.f32 %v3186_v13 }
0x1357   :  { %v4609_v15 = vpop.eup %4608  ;;  %3249 = vst [vmem:[%s5363_s4] sm:$0xff] %v3233_v12  ;;  %v3188_v16 = vpop.xlane.xlu1 %3187 }
0x1358   :  { %v3234_v54 = vsub.f32 %v5250_v1, %v3204_v44  ;;  %v3214_v63 = vmul.f32 0.6931472, %v4609_v15  ;;  %4622 = vlog2.f32 %v3188_v16 }
0x1359   :  { %v4611_v56 = vpop.eup %4610  ;;  %v3194_v57 = vpop.xlane.xlu0 %3193 }
0x135a   :  { %3250 = vst [vmem:[%s5363_s4 + $0x8] sm:$0xff] %v3234_v54  ;;  %v3239_v48 = vsub.f32 %v5253_v3, %v3214_v63  ;;  %v3216_v59 = vmul.f32 0.6931472, %v4611_v56  ;;  %4624 = vlog2.f32 %v3194_v57 }
0x135b   :  { %v4613_v60 = vpop.eup %4612 }
0x135c   :  { %3255 = vst [vmem:[%s5363_s4 + $0x30] sm:$0xff] %v3239_v48  ;;  %v3240_v61 = vsub.f32 %v5256_v20, %v3216_v59  ;;  %v3210_v1 = vmul.f32 0.6931472, %v4613_v60 }
0x135d   :  { %v4615_v6 = vpop.eup %4614  ;;  %v3196_v7 = vpop.xlane.xlu1 %3195 }
0x135e   :  { %3256 = vst [vmem:[%s5363_s4 + $0x38] sm:$0xff] %v3240_v61  ;;  %v3237_v8 = vsub.f32 %v5259_v52, %v3210_v1  ;;  %v3212_v17 = vmul.f32 0.6931472, %v4615_v6  ;;  %4626 = vlog2.f32 %v3196_v7  ;;  %v3198_v3 = vpop.xlane.xlu0 %3197 }
0x135f   :  { %v4617_v18 = vpop.eup %4616  ;;  %4628 = vlog2.f32 %v3198_v3 }
0x1360   :  { %3253 = vst [vmem:[%s5363_s4 + $0x20] sm:$0xff] %v3237_v8  ;;  %v3238_v20 = vsub.f32 %v5262_v26, %v3212_v17  ;;  %v3222_v28 = vmul.f32 0.6931472, %v4617_v18 }
0x1361   :  { %v4619_v29 = vpop.eup %4618  ;;  %v3200_v30 = vpop.xlane.xlu1 %3199 }
0x1362   :  { %3254 = vst [vmem:[%s5363_s4 + $0x28] sm:$0xff] %v3238_v20  ;;  %v3243_v52 = vsub.f32 %v5265_v11, %v3222_v28  ;;  %v3224_v31 = vmul.f32 0.6931472, %v4619_v29  ;;  %4630 = vlog2.f32 %v3200_v30 }
0x1363   :  { %v4621_v34 = vpop.eup %4620 }
0x1364   :  { %3259 = vst [vmem:[%s5363_s4 + $0x50] sm:$0xff] %v3243_v52  ;;  %v3244_v36 = vsub.f32 %v5268_v14, %v3224_v31  ;;  %v3218_v37 = vmul.f32 0.6931472, %v4621_v34 }
0x1365   :  { %v4623_v26 = vpop.eup %4622 }
0x1366   :  { %3260 = vst [vmem:[%s5363_s4 + $0x58] sm:$0xff] %v3244_v36  ;;  %v3241_v38 = vsub.f32 %v5272_v55, %v3218_v37  ;;  %v3220_v39 = vmul.f32 0.6931472, %v4623_v26 }
0x1367   :  { %v4625_v40 = vpop.eup %4624 }
0x1368   :  { %3257 = vst [vmem:[%s5363_s4 + $0x40] sm:$0xff] %v3241_v38  ;;  %v3242_v11 = vsub.f32 %v5276_v58, %v3220_v39  ;;  %v3226_v41 = vmul.f32 0.6931472, %v4625_v40 }
0x136a   :  { %3258 = vst [vmem:[%s5363_s4 + $0x48] sm:$0xff] %v3242_v11  ;;  %v3245_v14 = vsub.f32 %v5280_v5, %v3226_v41 }
0x136b   :  { %v4627_v42 = vpop.eup %4626 }
0x136c   :  { %v4629_v43 = vpop.eup %4628  ;;  %3261 = vst [vmem:[%s5363_s4 + $0x60] sm:$0xff] %v3245_v14  ;;  %v3228_v55 = vmul.f32 0.6931472, %v4627_v42 }
0x136d   :  { %v3230_v45 = vmul.f32 0.6931472, %v4629_v43 }
0x136e   :  { %v3246_v35 = vsub.f32 %v5284_v19, %v3228_v55 }
0x136f   :  { %v4631_v46 = vpop.eup %4630  ;;  %v3247_v58 = vsub.f32 %v5287_v21, %v3230_v45 }
0x1370   :  { %3262 = vst [vmem:[%s5363_s4 + $0x68] sm:$0xff] %v3246_v35  ;;  %v3232_v47 = vmul.f32 0.6931472, %v4631_v46 }
0x1371   :  { %3263 = vst [vmem:[%s5363_s4 + $0x70] sm:$0xff] %v3247_v58 }
0x1372   :  { %v3248_v5 = vsub.f32 %v5292_v33, %v3232_v47 }
0x1374   :  { %3264 = vst [vmem:[%s5363_s4 + $0x78] sm:$0xff] %v3248_v5 }

</bundles_post_ra>
